<compile_context>
chip_gen: v5e
topology: v5e:2x2
jax: 0.10.0
libtpu: 0.0.40
codegen_flags: <defaults>
</compile_context>

<pallas_src>
from functools import partial

import jax
import jax.numpy as jnp
from jax.experimental import pallas as pl
from jax.experimental.pallas import tpu as pltpu

LANE = 128  # feature dim / logits dim padded to this width -> lane-dense vregs


def _round_up(x, m):
    return (x + m - 1) // m * m


def _pad2(a, rows, cols):
    r, c = a.shape
    return jnp.pad(a, ((0, rows - r), (0, cols - c)))


# ---------------------------------------------------------------------------
# Kernel: grid = (stages, row_blocks); stage 0 = embedding, stage s = GCN s-1.
# ---------------------------------------------------------------------------
def _gcn_stage_kernel(adj_ref, x_ref, snorm_ref, wmat_ref, bvec_ref, cvec_ref,
                      rvec_ref, smat_ref, out_ref, hbuf, *, tm, np_rows):
    s = pl.program_id(0)                       # stage
    i = pl.program_id(1)                       # row block
    row0 = pl.multiple_of(i * tm, tm)

    write_slot = s % 2                         # ping-pong h buffers
    read_slot = 1 - write_slot
    w_off = pl.multiple_of(write_slot * np_rows + row0, 8)
    r_off = pl.multiple_of(read_slot * np_rows, 8)
    rr_off = pl.multiple_of(read_slot * np_rows + row0, 8)

    w = wmat_ref[0]                            # (D, D)  bf16
    b = bvec_ref[0]                            # (1, D)  f32
    c = cvec_ref[0]                            # (1, D)  f32  (folded BN const)
    res = rvec_ref[0]                          # (1, D)  f32  residual flag 0/1

    # zero the VMEM-resident logits accumulator once, at the very first step
    @pl.when((s == 0) & (i == 0))
    def _init():
        out_ref[...] = jnp.zeros_like(out_ref)

    # stage 0: embedding_h  ->  h0 = x @ We + be
    @pl.when(s == 0)
    def _embed():
        h0 = jnp.dot(x_ref[...], w, preferred_element_type=jnp.float32) + b
        hbuf[pl.ds(w_off, tm), :] = h0.astype(jnp.bfloat16)

    # stages 1..L: GCN layer (BN folded):
    #   H <- relu(((A @ H) @ W' + b') * snorm + c)  (+ H if residual)
    @pl.when(s > 0)
    def _gcn():
        h_full = hbuf[pl.ds(r_off, np_rows), :]                  # (Np, D) bf16
        agg = jnp.dot(adj_ref[...], h_full,
                      preferred_element_type=jnp.float32)        # (tm, D) f32
        z = jnp.dot(agg.astype(jnp.bfloat16), w,
                    preferred_element_type=jnp.float32) + b
        z = z * snorm_ref[...] + c                               # snorm: (tm,1)
        z = jnp.maximum(z, 0.0)
        h_prev = hbuf[pl.ds(rr_off, tm), :].astype(jnp.float32)
        z = z + res * h_prev
        hbuf[pl.ds(w_off, tm), :] = z.astype(jnp.bfloat16)

    # streaming skip + readout:  logits_rows += feats[s] @ (skip_w_i @ readout_i)
    # (smat[s] is zero for non-skip stages)
    h_rows = hbuf[pl.ds(w_off, tm), :]
    contrib = jnp.dot(h_rows, smat_ref[0], preferred_element_type=jnp.float32)
    out_ref[pl.ds(row0, tm), :] += contrib


# ---------------------------------------------------------------------------
# Wrapper: trace-time folding / padding, single pallas_call
# ---------------------------------------------------------------------------
def gcnnet2_forward(params, adj_norm, nodes_feat, nodes_num_norm_sqrt):
    N = nodes_feat.shape[0]
    L = len(params["gcn_layers"])
    S = L + 1
    D = LANE
    n_out = params["readout_w"].shape[1]
    skip_dim = params["skip_ws"][0].shape[1]

    # 256-row tiles fill the v6e/v7x 256x256 MXU; 128 is v5e-native.
    tm = 256 if _round_up(N, 128) >= 256 else 128
    Np = _round_up(N, tm)
    n_blocks = Np // tm

    # --- lane-dense, bf16-padded graph inputs -------------------------------
    adj_p = _pad2(adj_norm.astype(jnp.float32), Np, Np).astype(jnp.bfloat16)
    x_p = _pad2(nodes_feat.astype(jnp.float32), Np, D).astype(jnp.bfloat16)
    snorm_p = jnp.pad(nodes_num_norm_sqrt.astype(jnp.float32),
                      ((0, Np - N), (0, 0)))                      # (Np, 1)

    # --- per-stage params (stage 0 = embedding, stage s>=1 = GCN layer s-1) --
    wmat = [_pad2(params["emb_w"], D, D)]
    bvec = [_pad2(params["emb_b"], 1, D)]
    cvec = [jnp.zeros((1, D), jnp.float32)]
    rvec = [jnp.zeros((1, D), jnp.float32)]
    for lp in params["gcn_layers"]:
        scale = lp["gamma"] * jax.lax.rsqrt(lp["var"] + 1e-5)     # fold eval BN
        wmat.append(_pad2(lp["w"] * scale, D, D))
        bvec.append(_pad2(lp["b"] * scale, 1, D))
        cvec.append(_pad2(lp["beta"] - lp["mean"] * scale, 1, D))
        rvec.append(jnp.full((1, D), 1.0 if lp["residual"] else 0.0, jnp.float32))
    wmat = jnp.stack(wmat).astype(jnp.bfloat16)                   # (S, D, D)
    bvec = jnp.stack(bvec).astype(jnp.float32)                    # (S, 1, D)
    cvec = jnp.stack(cvec).astype(jnp.float32)                    # (S, 1, D)
    rvec = jnp.stack(rvec).astype(jnp.float32)                    # (S, 1, D)

    # --- compose skip linears with the readout, indexed by stage ------------
    #   concat(skips) @ R  ==  sum_i feats[idx_i] @ (skip_w_i @ R_i)
    smat = jnp.zeros((S, D, LANE), jnp.float32)
    for i, (sw, idx) in enumerate(zip(params["skip_ws"], params["skip_index"])):
        r_i = jnp.dot(sw, params["readout_w"][i * skip_dim:(i + 1) * skip_dim, :],
                      precision=jax.lax.Precision.HIGHEST)        # (d_i, n_out)
        smat = smat.at[int(idx)].add(_pad2(r_i, D, LANE))
    smat = smat.astype(jnp.bfloat16)                              # (S, D, LANE)

    # --- explicit VMEM budget (portable down to v7x's 64 MiB) ---------------
    vmem_need = (2 * tm * Np * 2                    # adj row block, dbl-buffered
                 + 2 * tm * (D * 2 + 4)             # x + snorm blocks
                 + 2 * (D * D * 2 + D * LANE * 2 + 3 * D * 4)   # stage params
                 + Np * LANE * 4                    # resident logits accumulator
                 + 2 * Np * D * 2)                  # h ping-pong scratch
    vmem_limit = int(min(96 * 2**20, max(32 * 2**20, 2 * vmem_need)))

    kern = partial(_gcn_stage_kernel, tm=tm, np_rows=Np)
    out = pl.pallas_call(
        kern,
        out_shape=jax.ShapeDtypeStruct((Np, LANE), jnp.float32),
        grid=(S, n_blocks),
        in_specs=[
            pl.BlockSpec((tm, Np), lambda s, i: (i, 0)),          # adj rows
            pl.BlockSpec((tm, D), lambda s, i: (i, 0)),           # node feats
            pl.BlockSpec((tm, 1), lambda s, i: (i, 0)),           # snorm column
            pl.BlockSpec((1, D, D), lambda s, i: (s, 0, 0)),      # W per stage
            pl.BlockSpec((1, 1, D), lambda s, i: (s, 0, 0)),      # bias
            pl.BlockSpec((1, 1, D), lambda s, i: (s, 0, 0)),      # BN const
            pl.BlockSpec((1, 1, D), lambda s, i: (s, 0, 0)),      # residual flag
            pl.BlockSpec((1, D, LANE), lambda s, i: (s, 0, 0)),   # skip@readout
        ],
        out_specs=pl.BlockSpec((Np, LANE), lambda s, i: (0, 0)),  # resident acc
        scratch_shapes=[pltpu.VMEM((2 * Np, D), jnp.bfloat16)],   # h ping-pong
        compiler_params=pltpu.CompilerParams(
            dimension_semantics=("arbitrary", "arbitrary"),
            vmem_limit_bytes=vmem_limit),
    )(adj_p, x_p, snorm_p, wmat, bvec, cvec, rvec, smat)

    logits = out[:N, :n_out].reshape(-1)
    return logits, jax.nn.sigmoid(logits)


# ---------------------------------------------------------------------------
# Pure-JAX reference (mirrors the PyTorch module semantics, f32 HIGHEST)
# ---------------------------------------------------------------------------
def gcnnet2_reference(params, adj_norm, nodes_feat, snorm):
    hp = jax.lax.Precision.HIGHEST
    h = jnp.dot(nodes_feat, params["emb_w"], precision=hp) + params["emb_b"]
    feats = [h]
    for lp in params["gcn_layers"]:
        agg = jnp.dot(adj_norm, h, precision=hp)
        z = jnp.dot(agg, lp["w"], precision=hp) + lp["b"]
        z = z * snorm
        z = (z - lp["mean"]) * jax.lax.rsqrt(lp["var"] + 1e-5) * lp["gamma"] + lp["beta"]
        z = jnp.maximum(z, 0.0)
        if lp["residual"]:
            z = z + h
        h = z
        feats.append(h)
    skips = [jnp.dot(feats[idx], sw, precision=hp)
             for sw, idx in zip(params["skip_ws"], params["skip_index"])]
    out_feat = jnp.concatenate(skips, axis=1)
    logits = jnp.dot(out_feat, params["readout_w"], precision=hp).reshape(-1)
    return logits, jax.nn.sigmoid(logits)


# ---------------------------------------------------------------------------
# Parameter init (deterministic, synthetic)
# ---------------------------------------------------------------------------
def init_gcnnet2_params(key, in_dim, hidden_dims, skip_dim, n_out):
    n_keys = 2 + 2 * len(hidden_dims) + 3 + 1
    keys = jax.random.split(key, n_keys)
    ki = iter(keys)
    p = {}
    p["emb_w"] = 0.1 * jax.random.normal(next(ki), (in_dim, in_dim), jnp.float32)
    p["emb_b"] = 0.01 * jax.random.normal(next(ki), (1, in_dim), jnp.float32)

    p["gcn_layers"] = []
    _in = in_dim
    for hd in hidden_dims:
        p["gcn_layers"].append({
            "w": 0.1 * jax.random.normal(next(ki), (_in, hd), jnp.float32),
            "b": 0.01 * jax.random.normal(next(ki), (1, hd), jnp.float32),
            "gamma": jnp.ones((1, hd), jnp.float32),
            "beta": jnp.zeros((1, hd), jnp.float32),
            "mean": jnp.zeros((1, hd), jnp.float32),
            "var": jnp.ones((1, hd), jnp.float32),
            "residual": (_in == hd),
        })
        _in = hd

    n_layers = len(hidden_dims)
    skip_index = [0, (n_layers + 1) // 2, n_layers]
    p["skip_index"] = skip_index
    skip_in_dims = [in_dim,
                    hidden_dims[skip_index[1] - 1],
                    hidden_dims[skip_index[2] - 1]]
    p["skip_ws"] = [0.1 * jax.random.normal(next(ki), (d, skip_dim), jnp.float32)
                    for d in skip_in_dims]
    p["readout_w"] = 0.1 * jax.random.normal(
        next(ki), (len(skip_in_dims) * skip_dim, n_out), jnp.float32)
    return p


# ---------------------------------------------------------------------------
# Example run
# ---------------------------------------------------------------------------
if __name__ == "__main__":
    key = jax.random.PRNGKey(0)
    k_graph, k_feat, k_param = jax.random.split(key, 3)

    N = 64
    in_dim = 32
    hidden_dims = [32, 32, 32, 32]
    skip_dim = 32
    n_out = 1

    # synthetic graph: ring + random edges, symmetric, no self-loops
    rand_adj = jax.random.bernoulli(k_graph, 0.1, (N, N)).astype(jnp.float32)
    adj = jnp.maximum(rand_adj, rand_adj.T)
    idx = jnp.arange(N)
    ring = jnp.zeros((N, N), jnp.float32)
    ring = ring.at[idx, (idx + 1) % N].set(1.0)
    ring = ring.at[(idx + 1) % N, idx].set(1.0)
    adj = jnp.maximum(adj, ring)
    adj = adj * (1.0 - jnp.eye(N, dtype=jnp.float32))
    deg = adj.sum(axis=1)
    d_inv_sqrt = 1.0 / jnp.sqrt(deg)                      # ring guarantees deg >= 2
    adj_norm = d_inv_sqrt[:, None] * adj * d_inv_sqrt[None, :]

    nodes_feat = jax.random.normal(k_feat, (N, in_dim), jnp.float32)
    nodes_num_norm_sqrt = jnp.full((N, 1), 1.0 / jnp.sqrt(N), jnp.float32)

    params = init_gcnnet2_params(k_param, in_dim, hidden_dims, skip_dim, n_out)

    logits, sig = gcnnet2_forward(params, adj_norm, nodes_feat, nodes_num_norm_sqrt)
    jax.block_until_ready((logits, sig))

    ref_logits, ref_sig = gcnnet2_reference(params, adj_norm, nodes_feat,
                                            nodes_num_norm_sqrt)

    assert logits.shape == (N,) and sig.shape == (N,)
    assert bool(jnp.all(jnp.isfinite(logits)))
    assert bool(jnp.all((sig >= 0) & (sig <= 1)))
    # bf16 MXU operands with f32 accumulation -> tolerance widened vs f32 reference
    assert bool(jnp.allclose(logits, ref_logits, atol=5e-2, rtol=5e-2))
    assert bool(jnp.allclose(sig, ref_sig, atol=2e-2, rtol=2e-2))
    print("KERNEL_OK")
</pallas_src>

<mosaic_0001>
module attributes {stable_mosaic.version = 11 : i64} {
  func.func @_gcn_stage_kernel(%arg0: i32, %arg1: i32, %arg2: memref<128x128xbf16, #tpu.memory_space<vmem>>, %arg3: memref<128x128xbf16, #tpu.memory_space<vmem>>, %arg4: memref<128x1xf32, #tpu.memory_space<vmem>>, %arg5: memref<1x128x128xbf16, #tpu.memory_space<vmem>>, %arg6: memref<1x1x128xf32, #tpu.memory_space<vmem>>, %arg7: memref<1x1x128xf32, #tpu.memory_space<vmem>>, %arg8: memref<1x1x128xf32, #tpu.memory_space<vmem>>, %arg9: memref<1x128x128xbf16, #tpu.memory_space<vmem>>, %arg10: memref<128x128xf32, #tpu.memory_space<vmem>>, %arg11: memref<256x128xbf16, #tpu.memory_space<vmem>>) attributes {dimension_semantics = [#tpu.dimension_semantics<arbitrary>, #tpu.dimension_semantics<arbitrary>], iteration_bounds = array<i64: 5, 1>, scalar_prefetch = 0 : i64, scratch_operands = 1 : i64, tpu.core_type = #tpu.core_type<tc>, window_params = [{transform_indices = @transform_0, window_bounds = array<i64: 128, 128>}, {transform_indices = @transform_1, window_bounds = array<i64: 128, 128>}, {transform_indices = @transform_2, window_bounds = array<i64: 128, 1>}, {transform_indices = @transform_3, window_bounds = array<i64: 1, 128, 128>}, {transform_indices = @transform_4, window_bounds = array<i64: 1, 1, 128>}, {transform_indices = @transform_5, window_bounds = array<i64: 1, 1, 128>}, {transform_indices = @transform_6, window_bounds = array<i64: 1, 1, 128>}, {transform_indices = @transform_7, window_bounds = array<i64: 1, 128, 128>}, {pipeline_mode = #tpu.pipeline_mode<synchronous>, transform_indices = @transform_8, window_bounds = array<i64: 128, 128>}]} {
    %c128_i32 = arith.constant 128 : i32
    %0 = arith.muli %arg1, %c128_i32 : i32
    %1 = tpu.assume_multiple %0, 128 : i32
    %c2_i32 = arith.constant 2 : i32
    %c0_i32 = arith.constant 0 : i32
    %2 = arith.cmpi eq, %c2_i32, %c0_i32 : i32
    %c1_i32 = arith.constant 1 : i32
    %3 = arith.select %2, %c1_i32, %c2_i32 : i32
    %4 = arith.remsi %arg0, %3 : i32
    %c0_i32_0 = arith.constant 0 : i32
    %5 = arith.cmpi ne, %4, %c0_i32_0 : i32
    %c0_i32_1 = arith.constant 0 : i32
    %6 = arith.cmpi slt, %4, %c0_i32_1 : i32
    %c0_i32_2 = arith.constant 0 : i32
    %7 = arith.cmpi slt, %3, %c0_i32_2 : i32
    %8 = arith.xori %6, %7 : i1
    %9 = arith.andi %8, %5 : i1
    %10 = arith.addi %4, %3 : i32
    %11 = arith.select %9, %10, %4 : i32
    %c1_i32_3 = arith.constant 1 : i32
    %12 = arith.subi %c1_i32_3, %11 : i32
    %c128_i32_4 = arith.constant 128 : i32
    %13 = arith.muli %11, %c128_i32_4 : i32
    %14 = arith.addi %13, %1 : i32
    %15 = tpu.assume_multiple %14, 8 : i32
    %c128_i32_5 = arith.constant 128 : i32
    %16 = arith.muli %12, %c128_i32_5 : i32
    %17 = tpu.assume_multiple %16, 8 : i32
    %c128_i32_6 = arith.constant 128 : i32
    %18 = arith.muli %12, %c128_i32_6 : i32
    %19 = arith.addi %18, %1 : i32
    %20 = tpu.assume_multiple %19, 8 : i32
    %c0 = arith.constant 0 : index
    %c0_7 = arith.constant 0 : index
    %c0_8 = arith.constant 0 : index
    %21 = vector.load %arg5[%c0, %c0_7, %c0_8] : memref<1x128x128xbf16, #tpu.memory_space<vmem>>, vector<1x128x128xbf16>
    %22 = vector.shape_cast %21 : vector<1x128x128xbf16> to vector<128x128xbf16>
    %c0_9 = arith.constant 0 : index
    %c0_10 = arith.constant 0 : index
    %c0_11 = arith.constant 0 : index
    %23 = vector.load %arg6[%c0_9, %c0_10, %c0_11] : memref<1x1x128xf32, #tpu.memory_space<vmem>>, vector<1x1x128xf32>
    %24 = vector.shape_cast %23 : vector<1x1x128xf32> to vector<1x128xf32>
    %c0_12 = arith.constant 0 : index
    %c0_13 = arith.constant 0 : index
    %c0_14 = arith.constant 0 : index
    %25 = vector.load %arg7[%c0_12, %c0_13, %c0_14] : memref<1x1x128xf32, #tpu.memory_space<vmem>>, vector<1x1x128xf32>
    %26 = vector.shape_cast %25 : vector<1x1x128xf32> to vector<1x128xf32>
    %c0_15 = arith.constant 0 : index
    %c0_16 = arith.constant 0 : index
    %c0_17 = arith.constant 0 : index
    %27 = vector.load %arg8[%c0_15, %c0_16, %c0_17] : memref<1x1x128xf32, #tpu.memory_space<vmem>>, vector<1x1x128xf32>
    %28 = vector.shape_cast %27 : vector<1x1x128xf32> to vector<1x128xf32>
    %c0_i32_18 = arith.constant 0 : i32
    %29 = arith.cmpi eq, %arg0, %c0_i32_18 : i32
    %c0_i32_19 = arith.constant 0 : i32
    %30 = arith.cmpi eq, %arg1, %c0_i32_19 : i32
    %31 = arith.andi %29, %30 : i1
    %32 = arith.extui %31 : i1 to i32
    %c0_i32_20 = arith.constant 0 : i32
    %33 = arith.cmpi ne, %32, %c0_i32_20 : i32
    scf.if %33 {
      %cst_31 = arith.constant 0.000000e+00 : f32
      %50 = vector.broadcast %cst_31 : f32 to vector<128x128xf32>
      %c0_32 = arith.constant 0 : index
      %c0_33 = arith.constant 0 : index
      %51 = vector.load %arg10[%c0_32, %c0_33] : memref<128x128xf32, #tpu.memory_space<vmem>>, vector<128x128xf32>
      tpu.vector_store %arg10[%c0_32, %c0_33], %50 {strides = array<i32>} : memref<128x128xf32, #tpu.memory_space<vmem>>, vector<128x128xf32>,
    } else {
    }
    %c0_i32_21 = arith.constant 0 : i32
    %34 = arith.cmpi eq, %arg0, %c0_i32_21 : i32
    %35 = arith.extui %34 : i1 to i32
    %c0_i32_22 = arith.constant 0 : i32
    %36 = arith.cmpi ne, %35, %c0_i32_22 : i32
    scf.if %36 {
      %c0_31 = arith.constant 0 : index
      %c0_32 = arith.constant 0 : index
      %50 = vector.load %arg3[%c0_31, %c0_32] : memref<128x128xbf16, #tpu.memory_space<vmem>>, vector<128x128xbf16>
      %cst_33 = arith.constant dense<0.000000e+00> : vector<128x128xf32>
      %51 = tpu.matmul %50, %22, %cst_33 {dimension_numbers = #tpu.dot_dimension_numbers<[1], [0], [0], [1], [0, 0, 1, 1], [], []>} : vector<128x128xbf16>, vector<128x128xbf16>, vector<128x128xf32> -> vector<128x128xf32>
      %52 = vector.broadcast %24 : vector<1x128xf32> to vector<128x128xf32>
      %53 = arith.addf %51, %52 : vector<128x128xf32>
      %54 = arith.truncf %53 : vector<128x128xf32> to vector<128x128xbf16>
      %55 = arith.index_cast %15 : i32 to index
      %c0_34 = arith.constant 0 : index
      %56 = vector.load %arg11[%55, %c0_34] : memref<256x128xbf16, #tpu.memory_space<vmem>>, vector<128x128xbf16>
      tpu.vector_store %arg11[%55, %c0_34], %54 {strides = array<i32>} : memref<256x128xbf16, #tpu.memory_space<vmem>>, vector<128x128xbf16>,
    } else {
    }
    %c0_i32_23 = arith.constant 0 : i32
    %37 = arith.cmpi sgt, %arg0, %c0_i32_23 : i32
    %38 = arith.extui %37 : i1 to i32
    %c0_i32_24 = arith.constant 0 : i32
    %39 = arith.cmpi ne, %38, %c0_i32_24 : i32
    scf.if %39 {
      %50 = arith.index_cast %17 : i32 to index
      %c0_31 = arith.constant 0 : index
      %51 = vector.load %arg11[%50, %c0_31] : memref<256x128xbf16, #tpu.memory_space<vmem>>, vector<128x128xbf16>
      %c0_32 = arith.constant 0 : index
      %c0_33 = arith.constant 0 : index
      %52 = vector.load %arg2[%c0_32, %c0_33] : memref<128x128xbf16, #tpu.memory_space<vmem>>, vector<128x128xbf16>
      %cst_34 = arith.constant dense<0.000000e+00> : vector<128x128xf32>
      %53 = tpu.matmul %52, %51, %cst_34 {dimension_numbers = #tpu.dot_dimension_numbers<[1], [0], [0], [1], [0, 0, 1, 1], [], []>} : vector<128x128xbf16>, vector<128x128xbf16>, vector<128x128xf32> -> vector<128x128xf32>
      %54 = arith.truncf %53 : vector<128x128xf32> to vector<128x128xbf16>
      %cst_35 = arith.constant dense<0.000000e+00> : vector<128x128xf32>
      %55 = tpu.matmul %54, %22, %cst_35 {dimension_numbers = #tpu.dot_dimension_numbers<[1], [0], [0], [1], [0, 0, 1, 1], [], []>} : vector<128x128xbf16>, vector<128x128xbf16>, vector<128x128xf32> -> vector<128x128xf32>
      %56 = vector.broadcast %24 : vector<1x128xf32> to vector<128x128xf32>
      %57 = arith.addf %55, %56 : vector<128x128xf32>
      %c0_36 = arith.constant 0 : index
      %c0_37 = arith.constant 0 : index
      %58 = vector.load %arg4[%c0_36, %c0_37] : memref<128x1xf32, #tpu.memory_space<vmem>>, vector<128x1xf32>
      %59 = vector.broadcast %58 : vector<128x1xf32> to vector<128x128xf32>
      %60 = arith.mulf %57, %59 : vector<128x128xf32>
      %61 = vector.broadcast %26 : vector<1x128xf32> to vector<128x128xf32>
      %62 = arith.addf %60, %61 : vector<128x128xf32>
      %cst_38 = arith.constant 0.000000e+00 : f32
      %63 = vector.broadcast %cst_38 : f32 to vector<128x128xf32>
      %64 = arith.maximumf %62, %63 : vector<128x128xf32>
      %65 = arith.index_cast %20 : i32 to index
      %c0_39 = arith.constant 0 : index
      %66 = vector.load %arg11[%65, %c0_39] : memref<256x128xbf16, #tpu.memory_space<vmem>>, vector<128x128xbf16>
      %67 = arith.extf %66 : vector<128x128xbf16> to vector<128x128xf32>
      %68 = vector.broadcast %28 : vector<1x128xf32> to vector<128x128xf32>
      %69 = arith.mulf %68, %67 : vector<128x128xf32>
      %70 = arith.addf %64, %69 : vector<128x128xf32>
      %71 = arith.truncf %70 : vector<128x128xf32> to vector<128x128xbf16>
      %72 = arith.index_cast %15 : i32 to index
      %c0_40 = arith.constant 0 : index
      %73 = vector.load %arg11[%72, %c0_40] : memref<256x128xbf16, #tpu.memory_space<vmem>>, vector<128x128xbf16>
      tpu.vector_store %arg11[%72, %c0_40], %71 {strides = array<i32>} : memref<256x128xbf16, #tpu.memory_space<vmem>>, vector<128x128xbf16>,
    } else {
    }
    %40 = arith.index_cast %15 : i32 to index
    %c0_25 = arith.constant 0 : index
    %41 = vector.load %arg11[%40, %c0_25] : memref<256x128xbf16, #tpu.memory_space<vmem>>, vector<128x128xbf16>
    %c0_26 = arith.constant 0 : index
    %c0_27 = arith.constant 0 : index
    %c0_28 = arith.constant 0 : index
    %42 = vector.load %arg9[%c0_26, %c0_27, %c0_28] : memref<1x128x128xbf16, #tpu.memory_space<vmem>>, vector<1x128x128xbf16>
    %43 = vector.shape_cast %42 : vector<1x128x128xbf16> to vector<128x128xbf16>
    %cst = arith.constant dense<0.000000e+00> : vector<128x128xf32>
    %44 = tpu.matmul %41, %43, %cst {dimension_numbers = #tpu.dot_dimension_numbers<[1], [0], [0], [1], [0, 0, 1, 1], [], []>} : vector<128x128xbf16>, vector<128x128xbf16>, vector<128x128xf32> -> vector<128x128xf32>
    %45 = arith.index_cast %1 : i32 to index
    %c0_29 = arith.constant 0 : index
    %46 = vector.load %arg10[%45, %c0_29] : memref<128x128xf32, #tpu.memory_space<vmem>>, vector<128x128xf32>
    %47 = arith.addf %46, %44 : vector<128x128xf32>
    %48 = arith.index_cast %1 : i32 to index
    %c0_30 = arith.constant 0 : index
    %49 = vector.load %arg10[%48, %c0_30] : memref<128x128xf32, #tpu.memory_space<vmem>>, vector<128x128xf32>
    tpu.vector_store %arg10[%48, %c0_30], %47 {strides = array<i32>} : memref<128x128xf32, #tpu.memory_space<vmem>>, vector<128x128xf32>,
    return
  }
  func.func @transform_0(%arg0: i32, %arg1: i32) -> (i32, i32) {
    %c0_i32 = arith.constant 0 : i32
    %c0_i32_0 = arith.constant 0 : i32
    return %arg1, %c0_i32 : i32, i32
  }
  func.func @transform_1(%arg0: i32, %arg1: i32) -> (i32, i32) {
    %c0_i32 = arith.constant 0 : i32
    %c0_i32_0 = arith.constant 0 : i32
    return %arg1, %c0_i32 : i32, i32
  }
  func.func @transform_2(%arg0: i32, %arg1: i32) -> (i32, i32) {
    %c0_i32 = arith.constant 0 : i32
    %c0_i32_0 = arith.constant 0 : i32
    return %arg1, %c0_i32 : i32, i32
  }
  func.func @transform_3(%arg0: i32, %arg1: i32) -> (i32, i32, i32) {
    %c0_i32 = arith.constant 0 : i32
    %c0_i32_0 = arith.constant 0 : i32
    %c0_i32_1 = arith.constant 0 : i32
    return %arg0, %c0_i32, %c0_i32_0 : i32, i32, i32
  }
  func.func @transform_4(%arg0: i32, %arg1: i32) -> (i32, i32, i32) {
    %c0_i32 = arith.constant 0 : i32
    %c0_i32_0 = arith.constant 0 : i32
    %c0_i32_1 = arith.constant 0 : i32
    return %arg0, %c0_i32, %c0_i32_0 : i32, i32, i32
  }
  func.func @transform_5(%arg0: i32, %arg1: i32) -> (i32, i32, i32) {
    %c0_i32 = arith.constant 0 : i32
    %c0_i32_0 = arith.constant 0 : i32
    %c0_i32_1 = arith.constant 0 : i32
    return %arg0, %c0_i32, %c0_i32_0 : i32, i32, i32
  }
  func.func @transform_6(%arg0: i32, %arg1: i32) -> (i32, i32, i32) {
    %c0_i32 = arith.constant 0 : i32
    %c0_i32_0 = arith.constant 0 : i32
    %c0_i32_1 = arith.constant 0 : i32
    return %arg0, %c0_i32, %c0_i32_0 : i32, i32, i32
  }
  func.func @transform_7(%arg0: i32, %arg1: i32) -> (i32, i32, i32) {
    %c0_i32 = arith.constant 0 : i32
    %c0_i32_0 = arith.constant 0 : i32
    %c0_i32_1 = arith.constant 0 : i32
    return %arg0, %c0_i32, %c0_i32_0 : i32, i32, i32
  }
  func.func @transform_8(%arg0: i32, %arg1: i32) -> (i32, i32) {
    %c0_i32 = arith.constant 0 : i32
    %c0_i32_0 = arith.constant 0 : i32
    %c0_i32_1 = arith.constant 0 : i32
    return %c0_i32, %c0_i32_0 : i32, i32
  }
}

</mosaic_0001>

<bundles_post_ra>
// kernel: tpu_custom_call.1
= control target key start
LH: loop header
LB: loop body
LE: loop exit
PB: predicated region body
PF: predicated region fallthrough
CT: control target
= control target key end

     0   :  { %s3178_s0 = inlined_call_operand.vmem [shape: bf16[128,128], index: 0, kind: input, shape index: {}]   ;;  %s3179_s1 = inlined_call_operand.vmem [shape: bf16[128,128], index: 1, kind: input, shape index: {}]   ;;  %s3180_s2 = inlined_call_operand.vmem [shape: f32[128,1], index: 2, kind: input, shape index: {}]   ;;  %s3181_s3 = inlined_call_operand.hbm [shape: bf16[5,128,128], index: 3, kind: input, shape index: {}]   ;;  %s3182_s4 = inlined_call_operand.hbm [shape: f32[5,1,128], index: 4, kind: input, shape index: {}]   ;;  %s3183_s5 = inlined_call_operand.hbm [shape: f32[5,1,128], index: 5, kind: input, shape index: {}]   ;;  %s3184_s6 = inlined_call_operand.hbm [shape: f32[5,1,128], index: 6, kind: input, shape index: {}]   ;;  %s3185_s7 = inlined_call_operand.hbm [shape: bf16[5,128,128], index: 7, kind: input, shape index: {}]   ;;  %s3186_s8 = inlined_call_operand.hbm [shape: f32[128,128], index: 8, kind: output, shape index: {}]  }
   0x1   :  { %3193 = sst [smem:[#allocation21_spill]] %s3178_s0 }
   0x2   :  { %3194 = sst [smem:[#allocation22_spill]] %s3179_s1 }
   0x3   :  { %3195 = sst [smem:[#allocation23_spill]] %s3180_s2 }
   0x4   :  { %3196 = sst [smem:[#allocation24_spill]] %s3181_s3 }
   0x5   :  { %3197 = sst [smem:[#allocation25_spill]] %s3182_s4 }
   0x6   :  { %3198 = sst [smem:[#allocation26_spill]] %s3184_s6 }
   0x7   :  { %3199 = sst [smem:[#allocation27_spill]] %s3186_s8 }
   0x8   :  { %13 = vsyncpa [#allocation4], 0 }
   0x9   :  { %15 = vsyncpa [#allocation4 + $0x1], 0 }
   0xa   :  { %16 = vsyncpa [#allocation7], 0 }
   0xb   :  { %18 = vsyncpa [#allocation7 + $0x1], 0 }
   0xc   :  { %19 = vsyncpa [#allocation10], 0 }
   0xd   :  { %21 = vsyncpa [#allocation10 + $0x1], 0 }
   0xe   :  { %22 = vsyncpa [#allocation5], 0  ;;  %s2670_s27 = smov 0   ;;  %s2672_s28 = smov 0  }
   0xf   :  { %s2674_s29 = smov 0   ;;  %s2676_s30 = smov 0  }
  0x10   :  { %s2678_s9 = smov 0   ;;  %s2680_s10 = smov 0  }
  0x11 LB: > { %3200 = sst [smem:[#allocation17_spill]] %s2604_s29  ;;  %s2699_s11 = sadd.s32 4294967295, %s2616_s10   ;;  %s2616_s10 = sphi %s2680_s10, %s28_s10   ;;  %s2612_s9 = sphi %s2678_s9, %s3223_s9   ;;  %s2608_s30 = sphi %s2676_s30, %s3222_s30   ;;  %s2604_s29 = sphi %s2674_s29, %s3218_s29   ;;  %s2600_s28 = sphi %s2672_s28, %s3221_s28   ;;  %s2596_s27 = sphi %s2670_s27, %s3220_s27  }
  0x12   : > { %3201 = sst [smem:[#allocation18_spill]] %s2616_s10  ;;  %s40_s12 = sadd.s32 1, %s2612_s9 }
  0x13   : > { %p42_p0 = scmp.ge.s32.totalorder %s40_s12, 5  ;;  %s125_s13 = sadd.s32 1, %s2604_s29 }
  0x14   : > { %p132_p1 = scmp.ne.s32.totalorder %s2604_s29, %s2600_s28  ;;  %p133_p2 = scmp.eq.s32.totalorder %s2616_s10, 0 }
  0x15   : > { %s3225_s12 = smov (%p42_p0, %s40_s12), 0  ;;  %p138_p4 = scmp.ne.s32.totalorder %s2600_s28, %s2596_s27 }
  0x16   : > { %3202 = sst [smem:[#allocation19_spill]] %s3225_s12  ;;  %p134_p3 = por %p133_p2, %p132_p1 }
  0x17   : > { %s122_s14 = ssub.s32 %s2612_s9, %s3225_s12  ;;  %p139_p5 = scmp.eq.s32.totalorder %s2699_s11, 0 }
  0x18   : > { %p123_p6 = scmp.eq.s32.totalorder %s122_s14, 0  ;;  %p2315_p8 = scmp.lt.s32.totalorder %s2616_s10, 5 }
  0x19   : > { %p2712_p7 = por %p139_p5, %p138_p4  ;;  %s2721_s17 = sand.u32 1, %s2604_s29  }
  0x1a   : > { %s2718_s16 = scalar_select %p123_p6, %s2604_s29, %s125_s13  }
  0x1b   : > { %p2723_p9 = pnand %p2315_p8, %p134_p3  ;;  %s336_s19 = sand.u32 1, %s2616_s10  }
  0x1c   : > { %3204 = sst [smem:[#allocation20_spill]] %s2718_s16  ;;  %s339_s23 = scalar_lea.vmem [#allocation6], %s2721_s17 }
  0x1d   : > { %s3206_s4 = sld [smem:[#allocation25_spill]]  ;;  %s346_s24 = sshll.u32 %s339_s23, 4  ;;  %s347_s24 = int_to_ptr.vmem [resolvable:$true] %s346_s24 }
  0x1e   : > { %p1785_p10 = scmp.ge.s32.totalorder %s2616_s10, 1  ;;  %s2734_s26 = scalar_lea.sflag [#allocation7], %s336_s19 }
  0x1f   : > { %p407_p11 = scmp.lt.s32.totalorder %s2616_s10, 6  ;;  %s3207_s6 = sld [smem:[#allocation26_spill]] }
  0x20   : > { %s3209_s3 = sld [smem:[#allocation24_spill]]  ;;  %s359_s8 = scalar_lea.hbm %s3183_s5, %s2612_s9 }
  0x21   : > { %p2744_p12 = pnand %p1785_p10, %p407_p11  ;;  %s361_s2 = sshll.u32 %s359_s8, 4  ;;  %s362_s2 = int_to_ptr.hbm [resolvable:$true] %s361_s2 }
  0x22   : > { %s356_s0 = scalar_lea.vmem [#allocation8], %s2721_s17  ;;  %s2779_s29 = sand.u32 (!%p2744_p12), 1, %s2600_s28  }
  0x23   : > { %s342_s22 = scalar_lea.hbm %s3206_s4, %s2612_s9  ;;  %s2749_s4 = scalar_lea.sflag [#allocation10], %s336_s19 }
  0x24   : > { %s344_s25 = sshll.u32 %s342_s22, 4  ;;  %s373_s22 = scalar_lea.vmem [#allocation9], %s2721_s17  ;;  %s345_s25 = int_to_ptr.hbm [resolvable:$true] %s344_s25 }
  0x25   : > { %2305 = dma.hbm_to_vmem [thread:$0]  (!%p2723_p9), %s345_s25, 16, %s347_s24, %s2734_s26  }
  0x26   : > { %s376_s14 = scalar_lea.hbm %s3207_s6, %s2612_s9  ;;  %s380_s23 = sshll.u32 %s373_s22, 4  ;;  %s381_s23 = int_to_ptr.vmem [resolvable:$true] %s380_s23 }
  0x27   : > { %s378_s21 = sshll.u32 %s376_s14, 4  ;;  %s1779_s24 = sshll.u32 %s2721_s17, 6  ;;  %s379_s21 = int_to_ptr.hbm [resolvable:$true] %s378_s21 }
  0x28   : > { %2311 = dma.hbm_to_vmem [thread:$0]  (!%p2723_p9), %s379_s21, 16, %s381_s23, %s2749_s4  }
  0x29   : > { %s2029_s25 = sshll.u32 %s2612_s9, 6  ;;  %s318_s16 = scalar_lea.vmem [#allocation3], %s1779_s24 }
  0x2a   : > { %s323_s6 = scalar_lea.hbm %s3209_s3, %s2029_s25  ;;  %s326_s14 = sshll.u32 %s318_s16, 4  ;;  %s327_s14 = int_to_ptr.vmem [resolvable:$true] %s326_s14 }
  0x2b   : > { %s324_s12 = sshll.u32 %s323_s6, 4  ;;  %s315_s22 = scalar_lea.sflag [#allocation4], %s2721_s17  ;;  %s325_s12 = int_to_ptr.hbm [resolvable:$true] %s324_s12 }
  0x2c   : > { %s2618_s19 = smov 64   ;;  %s2619_s21 = smov 4  }
  0x2d   : > { %2302 = dma.hbm_to_vmem [thread:$0]  (!%p2723_p9), %s325_s12, 1024, %s327_s14, %s315_s22, %s2618_s19, %s2618_s19, %s2619_s21  }
  0x2e   : > { %s396_s27 = scalar_lea.hbm %s3185_s7, %s2029_s25  ;;  %s391_s6 = scalar_lea.vmem [#allocation11], %s1779_s24 }
  0x2f   : > { %s397_s13 = sshll.u32 %s396_s27, 4  ;;  %s399_s3 = sshll.u32 %s391_s6, 4  ;;  %s398_s13 = int_to_ptr.hbm [resolvable:$true] %s397_s13  ;;  %s400_s3 = int_to_ptr.vmem [resolvable:$true] %s399_s3 }
  0x30   : > { %s363_s1 = sshll.u32 %s356_s0, 4  ;;  %411 = sbr.rel (%p2744_p12) target bundleno = 869 (0x365), region = 52  ;;  %s364_s1 = int_to_ptr.vmem [resolvable:$true] %s363_s1 }
  0x31   : > { %2308 = dma.hbm_to_vmem [thread:$0]  (!%p2723_p9), %s362_s2, 16, %s364_s1, %s2734_s26  }
  0x32   : > { %2314 = dma.hbm_to_vmem [thread:$0]  (!%p2723_p9), %s398_s13, 1024, %s400_s3, %s2749_s4, %s2618_s19, %s2618_s19, %s2619_s21  }
  0x33   : > { %s1786_s10 = sshll.u32 (!%p2744_p12), %s2779_s29, 6  ;;  %s414_s8 = scalar_lea.sflag (!%p2744_p12), [#allocation4], %s2779_s29 }
  0x34   : > { %s2785_s0 = scalar_lea.vmem (!%p2744_p12), [#allocation3], %s1786_s10 }
  0x35   : > { %2579 = dma.done.wait (%p2712_p7), %s414_s8, 1024  }
  0x36   : > { %2581 = vsyncadd (%p2712_p7), %s414_s8, 4294966272  ;;  %s423_s1 = sand.u32 1, %s2699_s11   ;;  %s426_s3 = scalar_lea.vmem [#allocation6], %s2779_s29 }
  0x37   : > { %s424_s2 = scalar_lea.sflag [#allocation7], %s423_s1 }
  0x38   : > { %2583 = dma.done.wait (%p2712_p7), %s424_s2, 32  }
  0x39   : > { %2585 = vsyncadd (%p2712_p7), %s424_s2, 4294967264  ;;  %s435_s4 = scalar_lea.vmem [#allocation8], %s2779_s29  ;;  %s442_s12 = scalar_lea.sflag [#allocation10], %s423_s1 }
  0x3a   : > { %s444_s17 = scalar_lea.vmem [#allocation9], %s2779_s29 }
  0x3b   : > { %2587 = dma.done.wait (%p2712_p7), %s442_s12, 1040  }
  0x3c   : > { %2589 = vsyncadd (%p2712_p7), %s442_s12, 4294966256  ;;  %s535_s18 = ssub.s32 0, %s2608_s30  ;;  %p570_p13 = scmp.eq.s32.totalorder %s2608_s30, 0  ;;  %v2811_v0 = vld [vmem:[%s2785_s0] sm:$0xf] }
  0x3d   : > { %s2806_s15 = smin.u32 %s2608_s30, %s535_s18  ;;  %p534_p0 = scmp.lt.s32.totalorder %s2608_s30, 0  ;;  %v2814_v1 = vld [vmem:[%s2785_s0] sm:$0xf]  ;;  %v2817_v2 = vld [vmem:[%s2785_s0] sm:$0xf0]  ;;  %v2620_v35 = vmov (%p570_p13), 0.0  }
  0x3e   : > { %s537_s26 = sand.u32 1, %s2806_s15   ;;  %v2820_v3 = vld [vmem:[%s2785_s0] sm:$0xf0]  ;;  %v2823_v4 = vld [vmem:[%s2785_s0 + $0x8] sm:$0xf]  ;;  %s2910_s19 = scalar_lea.vmem [#allocation11], %s1786_s10 }
  0x3f   : > { %s538_s20 = ssub.s32 0, %s537_s26  ;;  %v2826_v5 = vld [vmem:[%s2785_s0 + $0x8] sm:$0xf]  ;;  %v2829_v6 = vld [vmem:[%s2785_s0 + $0x8] sm:$0xf0]  ;;  %576 = vst [vmem:[#allocation12] sm:$0xff] (%p570_p13), %v2620_v35 }
  0x40   : > { %v2832_v7 = vld [vmem:[%s2785_s0 + $0x8] sm:$0xf0]  ;;  %v2835_v8 = vld [vmem:[%s2785_s0 + $0x10] sm:$0xf]  ;;  %v2841_v10 = vld [vmem:[%s2785_s0 + $0x10] sm:$0xf0]  ;;  %s3227_s20 = smov (!%p534_p0, %s538_s20), %s537_s26 }
  0x41   : > { %v2838_v9 = vld [vmem:[%s2785_s0 + $0x10] sm:$0xf]  ;;  %v2844_v11 = vld [vmem:[%s2785_s0 + $0x10] sm:$0xf0]  ;;  %v2847_v12 = vld [vmem:[%s2785_s0 + $0x18] sm:$0xf] }
  0x42   : > { %v2850_v13 = vld [vmem:[%s2785_s0 + $0x18] sm:$0xf]  ;;  %v2853_v14 = vld [vmem:[%s2785_s0 + $0x18] sm:$0xf0]  ;;  %v2859_v16 = vld [vmem:[%s2785_s0 + $0x20] sm:$0xf] }
  0x43   : > { %v2856_v15 = vld [vmem:[%s2785_s0 + $0x18] sm:$0xf0]  ;;  %v1845_v17 = vld [vmem:[%s2785_s0 + $0x20] sm:$0xf]  ;;  %v2863_v18 = vld [vmem:[%s2785_s0 + $0x20] sm:$0xf0] }
  0x44   : > { %v2040_v19 = vld [vmem:[%s2785_s0 + $0x20] sm:$0xf0]  ;;  %v2867_v20 = vld [vmem:[%s2785_s0 + $0x28] sm:$0xf]  ;;  %v2871_v22 = vld [vmem:[%s2785_s0 + $0x28] sm:$0xf0] }
  0x45   : > { %v1849_v21 = vld [vmem:[%s2785_s0 + $0x28] sm:$0xf]  ;;  %v2042_v23 = vld [vmem:[%s2785_s0 + $0x28] sm:$0xf0]  ;;  %v2877_v24 = vld [vmem:[%s2785_s0 + $0x30] sm:$0xf] }
  0x46   : > { %v1853_v25 = vld [vmem:[%s2785_s0 + $0x30] sm:$0xf]  ;;  %v2881_v26 = vld [vmem:[%s2785_s0 + $0x30] sm:$0xf0]  ;;  %v2885_v28 = vld [vmem:[%s2785_s0 + $0x38] sm:$0xf] }
  0x47   : > { %v2044_v27 = vld [vmem:[%s2785_s0 + $0x30] sm:$0xf0]  ;;  %v1857_v29 = vld [vmem:[%s2785_s0 + $0x38] sm:$0xf]  ;;  %v2889_v30 = vld [vmem:[%s2785_s0 + $0x38] sm:$0xf0] }
  0x48   : > { %v2046_v31 = vld [vmem:[%s2785_s0 + $0x38] sm:$0xf0]  ;;  %v2894_v32 = vld [vmem:[%s426_s3] sm:$0x1]  ;;  %p1790_p1 = scmp.lt.s32.totalorder %s3227_s20, 0  ;;  %s544_s24 = sadd.s32 2, %s3227_s20 }
  0x49   : > { %v2898_v33 = vld [vmem:[%s435_s4] sm:$0x1]  ;;  %575 = sbr.rel (!%p570_p13) target bundleno = 88 (0x58), region = 76  ;;  %577 = vst [vmem:[#allocation12 + $0x8] sm:$0xff] (%p570_p13), %v2620_v35 }
  0x4a   : > { %v2902_v34 = vld [vmem:[%s444_s17] sm:$0x1]  ;;  %s3229_s24 = smov (!%p1790_p1, %s544_s24), %s3227_s20  ;;  %578 = vst [vmem:[#allocation12 + $0x10] sm:$0xff] (%p570_p13), %v2620_v35 }
  0x4b   : > { %s546_s25 = ssub.s32 1, %s3229_s24  ;;  %s2904_s14 = sshll.u32 %s3229_s24, 7  ;;  %579 = vst [vmem:[#allocation12 + $0x18] sm:$0xff] (%p570_p13), %v2620_v35 }
  0x4c   : > { %s2906_s22 = sshll.u32 %s546_s25, 7  ;;  %580 = vst [vmem:[#allocation12 + $0x20] sm:$0xff] (%p570_p13), %v2620_v35 }
  0x4d   : > { %581 = vst [vmem:[#allocation12 + $0x28] sm:$0xff] (%p570_p13), %v2620_v35 }
  0x4e   : > { %582 = vst [vmem:[#allocation12 + $0x30] sm:$0xff] %v2620_v35 }
  0x4f   : > { %583 = vst [vmem:[#allocation12 + $0x38] sm:$0xff] %v2620_v35 }
  0x50   : > { %584 = vst [vmem:[#allocation12 + $0x40] sm:$0xff] %v2620_v35 }
  0x51   : > { %585 = vst [vmem:[#allocation12 + $0x48] sm:$0xff] %v2620_v35 }
  0x52   : > { %586 = vst [vmem:[#allocation12 + $0x50] sm:$0xff] %v2620_v35 }
  0x53   : > { %587 = vst [vmem:[#allocation12 + $0x58] sm:$0xff] %v2620_v35 }
  0x54   : > { %588 = vst [vmem:[#allocation12 + $0x60] sm:$0xff] %v2620_v35 }
  0x55   : > { %589 = vst [vmem:[#allocation12 + $0x68] sm:$0xff] %v2620_v35 }
  0x56   : > { %590 = vst [vmem:[#allocation12 + $0x70] sm:$0xff] %v2620_v35 }
  0x57   : > { %591 = vst [vmem:[#allocation12 + $0x78] sm:$0xff] %v2620_v35 }
  0x58 PF: > { %p1794_p2 = scmp.ne.s32.totalorder %s2608_s30, 0 }
  0x59   : > { %s3210_s27 = sld [smem:[#allocation22_spill]] (!%p1794_p2)  ;;  %s775_s26 = sshra.s32 (!%p1794_p2), %s2904_s14, 3 }
  0x5a   : > { %594 = sbr.rel (%p1794_p2) target bundleno = 291 (0x123), region = 80  ;;  %s1859_s20 = sshll.u32 (!%p1794_p2), %s775_s26, 2 }
  0x5b   : > { %s2949_s24 = scalar_lea.vmem (!%p1794_p2), [#allocation2], %s1859_s20 }
  0x5f   : > { %v1858_v36 = vor.u32 %v2046_v31, %v1857_v29  ;;  %v1854_v37 = vor.u32 %v2044_v27, %v1853_v25  ;;  %v1850_v38 = vor.u32 %v2042_v23, %v1849_v21  ;;  %v1846_v39 = vor.u32 %v2040_v19, %v1845_v17  ;;  %s3211_s13 = smov %s3210_s27  ;;  %v2048_v44 = vld [vmem:[%s3210_s27] sm:$0xff] }
  0x60   : > { %v1842_v40 = vor.u32 %v2856_v15, %v2850_v13  ;;  %v1838_v41 = vor.u32 %v2844_v11, %v2838_v9  ;;  %v1834_v42 = vor.u32 %v2832_v7, %v2826_v5  ;;  %v1830_v43 = vor.u32 %v2820_v3, %v2814_v1  ;;  %v2050_v45 = vld [vmem:[%s3211_s13 + $0x10] sm:$0xff]  ;;  %v2052_v46 = vld [vmem:[%s3211_s13 + $0x20] sm:$0xff]  ;;  %v2049_v48 = vld [vmem:[%s3211_s13 + $0x8] sm:$0xff] }
  0x61   : > { %710 = vmatpush.bf16.msra.mxu0 %v1858_v36  ;;  %2221 = vmatpush.bf16.msra.mxu1 %v1858_v36  ;;  %v2054_v47 = vld [vmem:[%s3211_s13 + $0x30] sm:$0xff]  ;;  %v2051_v49 = vld [vmem:[%s3211_s13 + $0x18] sm:$0xff]  ;;  %v2053_v50 = vld [vmem:[%s3211_s13 + $0x28] sm:$0xff]  ;;  %v612_v54 = vperm.slane %v2894_v32, 0 }
  0x62   : > { %2222 = vmatpush.bf16.msra.mxu2 %v1858_v36  ;;  %2223 = vmatpush.bf16.msra.mxu3 %v1858_v36  ;;  %v2055_v51 = vld [vmem:[%s3211_s13 + $0x38] sm:$0xff] }
  0x65   : > { %711 = vmatpush.bf16.msra.mxu0 %v1854_v37  ;;  %2224 = vmatpush.bf16.msra.mxu1 %v1854_v37 }
  0x66   : > { %2225 = vmatpush.bf16.msra.mxu2 %v1854_v37  ;;  %2226 = vmatpush.bf16.msra.mxu3 %v1854_v37 }
  0x69   : > { %712 = vmatpush.bf16.msra.mxu0 %v1850_v38  ;;  %2227 = vmatpush.bf16.msra.mxu1 %v1850_v38 }
  0x6a   : > { %2228 = vmatpush.bf16.msra.mxu2 %v1850_v38  ;;  %2229 = vmatpush.bf16.msra.mxu3 %v1850_v38 }
  0x6d   : > { %713 = vmatpush.bf16.msra.mxu0 %v1846_v39  ;;  %2230 = vmatpush.bf16.msra.mxu1 %v1846_v39 }
  0x6e   : > { %2231 = vmatpush.bf16.msra.mxu2 %v1846_v39  ;;  %2232 = vmatpush.bf16.msra.mxu3 %v1846_v39 }
  0x71   : > { %714 = vmatpush.bf16.msra.mxu0 %v1842_v40  ;;  %2233 = vmatpush.bf16.msra.mxu1 %v1842_v40 }
  0x72   : > { %2234 = vmatpush.bf16.msra.mxu2 %v1842_v40  ;;  %2235 = vmatpush.bf16.msra.mxu3 %v1842_v40 }
  0x75   : > { %715 = vmatpush.bf16.msra.mxu0 %v1838_v41  ;;  %2236 = vmatpush.bf16.msra.mxu1 %v1838_v41 }
  0x76   : > { %2237 = vmatpush.bf16.msra.mxu2 %v1838_v41  ;;  %2238 = vmatpush.bf16.msra.mxu3 %v1838_v41 }
  0x79   : > { %716 = vmatpush.bf16.msra.mxu0 %v1834_v42  ;;  %2239 = vmatpush.bf16.msra.mxu1 %v1834_v42 }
  0x7a   : > { %2240 = vmatpush.bf16.msra.mxu2 %v1834_v42  ;;  %2241 = vmatpush.bf16.msra.mxu3 %v1834_v42 }
  0x7d   : > { %717 = vmatpush.bf16.msra.mxu0 %v1830_v43  ;;  %2242 = vmatpush.bf16.msra.mxu1 %v1830_v43 }
  0x7e   : > { %2243 = vmatpush.bf16.msra.mxu2 %v1830_v43  ;;  %2244 = vmatpush.bf16.msra.mxu3 %v1830_v43 }
  0x80   : > { %718 = vmatmul.bf16.vlgmr.msra.gmra.mxu0 %v2048_v44  ;;  %728 = vmatmul.bf16.vlgmr.msra.gmra.mxu1 %v2050_v45 }
  0x81   : > { %738 = vmatmul.bf16.vlgmr.msra.gmra.mxu2 %v2052_v46  ;;  %748 = vmatmul.bf16.vlgmr.msra.gmra.mxu3 %v2054_v47 }
  0x90   : > { %723 = vmatmul.bf16.gmra.mxu0 %v2049_v48  ;;  %733 = vmatmul.bf16.gmra.mxu1 %v2051_v49 }
  0x91   : > { %743 = vmatmul.bf16.gmra.mxu2 %v2053_v50  ;;  %753 = vmatmul.bf16.gmra.mxu3 %v2055_v51 }
  0xfd   : > { %v719_v52 = vpop.f32.mrf.mxu0  ;;  %v729_v53 = vpop.f32.mrf.mxu1 }
  0xfe   : > { %v720_v59 = vadd.f32 %v719_v52, %v612_v54  ;;  %v730_v60 = vadd.f32 %v729_v53, %v612_v54 }
 0x104   : > { %v739_v55 = vpop.f32.mrf.mxu2  ;;  %v749_v56 = vpop.f32.mrf.mxu3 }
 0x105   : > { %v721_v57 = vpop.f32.mrf.mxu0  ;;  %v731_v58 = vpop.f32.mrf.mxu1  ;;  %v740_v7 = vadd.f32 %v739_v55, %v612_v54  ;;  %v750_v9 = vadd.f32 %v749_v56, %v612_v54 }
 0x106   : > { %v722_v61 = vadd.f32 %v721_v57, %v612_v54  ;;  %v732_v62 = vadd.f32 %v731_v58, %v612_v54 }
 0x108   : > { %v2091_v63 = vpack.c.bf16 %v722_v61, %v720_v59  ;;  %v2101_v1 = vpack.c.bf16 %v732_v62, %v730_v60 }
 0x10a   : > { %2092 = vst [vmem:[%s2949_s24] sm:$0xff] %v2091_v63  }
 0x10b   : > { %2201 = vst [vmem:[%s2949_s24 + $0x10] sm:$0xff] %v2101_v1  }
 0x10c   : > { %v741_v3 = vpop.f32.mrf.mxu2  ;;  %v751_v5 = vpop.f32.mrf.mxu3 }
 0x10d   : > { %v742_v11 = vadd.f32 %v741_v3, %v612_v54  ;;  %v752_v13 = vadd.f32 %v751_v5, %v612_v54  ;;  %v724_v15 = vpop.f32.mrf.mxu0  ;;  %v734_v17 = vpop.f32.mrf.mxu1 }
 0x10e   : > { %v725_v31 = vadd.f32 %v724_v15, %v612_v54  ;;  %v735_v35 = vadd.f32 %v734_v17, %v612_v54 }
 0x10f   : > { %v2111_v19 = vpack.c.bf16 %v742_v11, %v740_v7  ;;  %v2121_v21 = vpack.c.bf16 %v752_v13, %v750_v9 }
 0x111   : > { %2203 = vst [vmem:[%s2949_s24 + $0x20] sm:$0xff] %v2111_v19  }
 0x112   : > { %2205 = vst [vmem:[%s2949_s24 + $0x30] sm:$0xff] %v2121_v21  }
 0x114   : > { %v744_v23 = vpop.f32.mrf.mxu2  ;;  %v754_v25 = vpop.f32.mrf.mxu3 }
 0x115   : > { %v726_v27 = vpop.f32.mrf.mxu0  ;;  %v736_v29 = vpop.f32.mrf.mxu1  ;;  %v745_v42 = vadd.f32 %v744_v23, %v612_v54  ;;  %v755_v43 = vadd.f32 %v754_v25, %v612_v54 }
 0x116   : > { %v727_v36 = vadd.f32 %v726_v27, %v612_v54  ;;  %v737_v37 = vadd.f32 %v736_v29, %v612_v54 }
 0x118   : > { %v2096_v38 = vpack.c.bf16 %v727_v36, %v725_v31  ;;  %v2106_v39 = vpack.c.bf16 %v737_v37, %v735_v35 }
 0x11a   : > { %2200 = vst [vmem:[%s2949_s24 + $0x8] sm:$0xff] %v2096_v38  }
 0x11b   : > { %2202 = vst [vmem:[%s2949_s24 + $0x18] sm:$0xff] %v2106_v39  }
 0x11c   : > { %v746_v40 = vpop.f32.mrf.mxu2  ;;  %v756_v41 = vpop.f32.mrf.mxu3 }
 0x11d   : > { %v747_v44 = vadd.f32 %v746_v40, %v612_v54  ;;  %v757_v45 = vadd.f32 %v756_v41, %v612_v54 }
 0x11f   : > { %v2116_v46 = vpack.c.bf16 %v747_v44, %v745_v42  ;;  %v2126_v47 = vpack.c.bf16 %v757_v45, %v755_v43 }
 0x121   : > { %2204 = vst [vmem:[%s2949_s24 + $0x28] sm:$0xff] %v2116_v46  }
 0x122   : > { %2206 = vst [vmem:[%s2949_s24 + $0x38] sm:$0xff] %v2126_v47  }
 0x123 PF: > { %p1860_p3 = scmp.le.s32.totalorder %s2608_s30, 0 }
 0x124   : > { %s799_s25 = sshra.s32 (!%p1860_p3), %s2906_s22, 3  ;;  %s3212_s27 = sld [smem:[#allocation21_spill]] (!%p1860_p3) }
 0x125   : > { %798 = sbr.rel (%p1860_p3) target bundleno = 673 (0x2a1), region = 84  ;;  %s1861_s21 = sshll.u32 (!%p1860_p3), %s799_s25, 2 }
 0x126   : > { %s2961_s23 = scalar_lea.vmem (!%p1860_p3), [#allocation2], %s1861_s21  ;;  %s3214_s25 = sld [smem:[#allocation23_spill]] (!%p1860_p3) }
 0x127   : > { %s1322_s2 = sshra.s32 (!%p1860_p3), %s2904_s14, 3 }
 0x128   : > { %s1959_s3 = sshll.u32 (!%p1860_p3), %s1322_s2, 2 }
 0x129   : > { %s3088_s4 = scalar_lea.vmem (!%p1860_p3), [#allocation2], %s1959_s3 }
 0x12a   : > { %v2063_v48 = vld [vmem:[%s2961_s23 + $0x38] sm:$0xff]  ;;  %v2062_v49 = vld [vmem:[%s2961_s23 + $0x30] sm:$0xff]  ;;  %v2061_v50 = vld [vmem:[%s2961_s23 + $0x28] sm:$0xff]  ;;  %s3213_s6 = smov %s3212_s27  ;;  %v1957_v60 = vor.u32 %v2889_v30, %v2885_v28  ;;  %v1953_v61 = vor.u32 %v2881_v26, %v2877_v24  ;;  %v1949_v62 = vor.u32 %v2871_v22, %v2867_v20  ;;  %v1945_v63 = vor.u32 %v2863_v18, %v2859_v16 }
 0x12b   : > { %931 = vmatpush.bf16.msra.mxu0 %v2063_v48  ;;  %2245 = vmatpush.bf16.msra.mxu2 %v2063_v48  ;;  %v2060_v51 = vld [vmem:[%s2961_s23 + $0x20] sm:$0xff]  ;;  %v2059_v52 = vld [vmem:[%s2961_s23 + $0x18] sm:$0xff]  ;;  %v2058_v53 = vld [vmem:[%s2961_s23 + $0x10] sm:$0xff]  ;;  %v1941_v24 = vor.u32 %v2853_v14, %v2847_v12  ;;  %v1937_v20 = vor.u32 %v2841_v10, %v2835_v8  ;;  %v1933_v12 = vor.u32 %v2829_v6, %v2823_v4  ;;  %v2621_v22 = vmov 0  }
 0x12c   : > { %v2057_v54 = vld [vmem:[%s2961_s23 + $0x8] sm:$0xff]  ;;  %v2056_v55 = vld [vmem:[%s2961_s23] sm:$0xff]  ;;  %1039 = vmatpush.bf16.msra.mxu1 %v1957_v60  ;;  %2253 = vmatpush.bf16.msra.mxu3 %v1957_v60  ;;  %v2066_v1 = vld [vmem:[%s3213_s6 + $0x10] sm:$0xff]  ;;  %v1929_v14 = vor.u32 %v2817_v2, %v2811_v0 }
 0x12d   : > { %v2064_v56 = vld [vmem:[%s3212_s27] sm:$0xff]  ;;  %v2065_v58 = vld [vmem:[%s3213_s6 + $0x8] sm:$0xff]  ;;  %v2070_v28 = vld [vmem:[%s3213_s6 + $0x30] sm:$0xff]  ;;  %2373 = vset.pattern.permute.xlu0 %v2621_v22  ;;  %2374 = vset.pattern.permute.xlu1 %v2621_v22 }
 0x12e   : > { %v2068_v57 = vld [vmem:[%s3213_s6 + $0x20] sm:$0xff]  ;;  %v2069_v59 = vld [vmem:[%s3213_s6 + $0x28] sm:$0xff]  ;;  %v2067_v16 = vld [vmem:[%s3213_s6 + $0x18] sm:$0xff]  ;;  %2375 = vset.pattern.permute.xlu2 %v2621_v22 }
 0x12f   : > { %932 = vmatpush.bf16.msra.mxu0 %v2062_v49  ;;  %2246 = vmatpush.bf16.msra.mxu2 %v2062_v49  ;;  %v2071_v18 = vld [vmem:[%s3213_s6 + $0x38] sm:$0xff]  ;;  %v1088_v26 = vld [vmem:[%s3214_s25] sm:$0xff]  ;;  %v1089_v4 = vld [vmem:[%s3214_s25 + $0x8] sm:$0xff] }
 0x130   : > { %1040 = vmatpush.bf16.msra.mxu1 %v1953_v61  ;;  %2254 = vmatpush.bf16.msra.mxu3 %v1953_v61  ;;  %v1090_v0 = vld [vmem:[%s3214_s25 + $0x10] sm:$0xff]  ;;  %v1091_v8 = vld [vmem:[%s3214_s25 + $0x18] sm:$0xff]  ;;  %v1097_v10 = vld [vmem:[%s3214_s25 + $0x48] sm:$0xff]  ;;  %v3068_v61 = vperm.slane %v2898_v33, 0 }
 0x131   : > { %1106 = vperm.xlu0 %2373, %v1088_v26   ;;  %v1094_v2 = vld [vmem:[%s3214_s25 + $0x30] sm:$0xff]  ;;  %1116 = vperm.xlu1 %2374, %v1090_v0   ;;  %v1092_v7 = vld [vmem:[%s3214_s25 + $0x20] sm:$0xff]  ;;  %v1095_v9 = vld [vmem:[%s3214_s25 + $0x38] sm:$0xff] }
 0x132   : > { %v1100_v11 = vld [vmem:[%s3214_s25 + $0x60] sm:$0xff]  ;;  %1126 = vperm.xlu2 %2375, %v1092_v7   ;;  %v1093_v19 = vld [vmem:[%s3214_s25 + $0x28] sm:$0xff]  ;;  %v1098_v21 = vld [vmem:[%s3214_s25 + $0x50] sm:$0xff] }
 0x133   : > { %933 = vmatpush.bf16.msra.mxu0 %v2061_v50  ;;  %2247 = vmatpush.bf16.msra.mxu2 %v2061_v50  ;;  %v1103_v23 = vld [vmem:[%s3214_s25 + $0x78] sm:$0xff]  ;;  %v1096_v31 = vld [vmem:[%s3214_s25 + $0x40] sm:$0xff]  ;;  %v1101_v35 = vld [vmem:[%s3214_s25 + $0x68] sm:$0xff] }
 0x134   : > { %1041 = vmatpush.bf16.msra.mxu1 %v1949_v62  ;;  %2255 = vmatpush.bf16.msra.mxu3 %v1949_v62  ;;  %v1099_v39 = vld [vmem:[%s3214_s25 + $0x58] sm:$0xff]  ;;  %v1102_v43 = vld [vmem:[%s3214_s25 + $0x70] sm:$0xff]  ;;  %v2129_v62 = vld [vmem:[%s2961_s23] sm:$0xff]  }
 0x137   : > { %934 = vmatpush.bf16.msra.mxu0 %v2060_v51  ;;  %2248 = vmatpush.bf16.msra.mxu2 %v2060_v51 }
 0x138   : > { %1042 = vmatpush.bf16.msra.mxu1 %v1945_v63  ;;  %2256 = vmatpush.bf16.msra.mxu3 %v1945_v63  ;;  %v2130_v63 = vunpack.c.l.bf16 %v2129_v62 }
 0x139   : > { %1111 = vperm.xlu0 %2373, %v1089_v4   ;;  %1121 = vperm.xlu1 %2374, %v1091_v8  }
 0x13a   : > { %1131 = vperm.xlu2 %2375, %v1093_v19  }
 0x13b   : > { %935 = vmatpush.bf16.msra.mxu0 %v2059_v52  ;;  %2249 = vmatpush.bf16.msra.mxu2 %v2059_v52 }
 0x13c   : > { %1043 = vmatpush.bf16.msra.mxu1 %v1941_v24  ;;  %2257 = vmatpush.bf16.msra.mxu3 %v1941_v24 }
 0x13f   : > { %936 = vmatpush.bf16.msra.mxu0 %v2058_v53  ;;  %2250 = vmatpush.bf16.msra.mxu2 %v2058_v53 }
 0x140   : > { %1044 = vmatpush.bf16.msra.mxu1 %v1937_v20  ;;  %2258 = vmatpush.bf16.msra.mxu3 %v1937_v20 }
 0x141   : > { %1136 = vperm.xlu0 %2373, %v1094_v2   ;;  %1141 = vperm.xlu1 %2374, %v1095_v9  }
 0x142   : > { %1146 = vperm.xlu2 %2375, %v1096_v31  }
 0x143   : > { %937 = vmatpush.bf16.msra.mxu0 %v2057_v54  ;;  %2251 = vmatpush.bf16.msra.mxu2 %v2057_v54  ;;  %v3062_v54 = vperm.slane %v2894_v32, 0 }
 0x144   : > { %1045 = vmatpush.bf16.msra.mxu1 %v1933_v12  ;;  %2259 = vmatpush.bf16.msra.mxu3 %v1933_v12 }
 0x147   : > { %938 = vmatpush.bf16.msra.mxu0 %v2056_v55  ;;  %2252 = vmatpush.bf16.msra.mxu2 %v2056_v55 }
 0x148   : > { %1046 = vmatpush.bf16.msra.mxu1 %v1929_v14  ;;  %2260 = vmatpush.bf16.msra.mxu3 %v1929_v14 }
 0x149   : > { %1151 = vperm.xlu0 %2373, %v1097_v10   ;;  %1156 = vperm.xlu1 %2374, %v1098_v21  }
 0x14a   : > { %939 = vmatmul.bf16.vlgmr.msra.gmra.mxu0 %v2064_v56  ;;  %959 = vmatmul.bf16.vlgmr.msra.gmra.mxu2 %v2068_v57 }
 0x14b   : > { %1161 = vperm.xlu2 %2375, %v1099_v39  }
 0x151   : > { %1166 = vperm.xlu0 %2373, %v1100_v11   ;;  %1171 = vperm.xlu1 %2374, %v1101_v35  }
 0x153   : > { %1176 = vperm.xlu2 %2375, %v1102_v43  }
 0x159   : > { %1181 = vperm.xlu0 %2373, %v1103_v23  }
 0x15a   : > { %944 = vmatmul.bf16.gmra.mxu0 %v2065_v58  ;;  %964 = vmatmul.bf16.gmra.mxu2 %v2069_v59 }
 0x16a   : > { %949 = vmatmul.bf16.gmra.mxu0 %v2066_v1  ;;  %969 = vmatmul.bf16.gmra.mxu2 %v2070_v28  ;;  %v3072_v1 = vperm.slane %v2902_v34, 0 }
 0x16c   : > { %v1274_v12 = vmul.f32 %v2130_v63, %v3072_v1 }
 0x17a   : > { %954 = vmatmul.bf16.gmra.mxu0 %v2067_v16  ;;  %974 = vmatmul.bf16.gmra.mxu2 %v2071_v18  ;;  %v2131_v16 = vunpack.c.h.bf16 %v2129_v62 }
 0x17c   : > { %v1275_v34 = vmul.f32 %v2131_v16, %v3072_v1 }
 0x18c   : > { %v3059_v53 = vpop.permute.xlu2 %1126 }
 0x194   : > { %v3065_v59 = vpop.permute.xlu2 %1131 }
 0x19c   : > { %v1147_v0 = vpop.permute.xlu2 %1146 }
 0x1a3   : > { %v1107_v52 = vpop.permute.xlu0 %1106  ;;  %v1117_v55 = vpop.permute.xlu1 %1116 }
 0x1ab   : > { %v1112_v58 = vpop.permute.xlu0 %1111  ;;  %v1122_v18 = vpop.permute.xlu1 %1121 }
 0x1b3   : > { %v3077_v14 = vpop.permute.xlu0 %1136  ;;  %v3085_v9 = vpop.permute.xlu1 %1141 }
 0x1c7   : > { %v940_v6 = vpop.f32.mrf.mxu0 }
 0x1cd   : > { %v960_v30 = vpop.f32.mrf.mxu2 }
 0x1cf   : > { %v942_v3 = vpop.f32.mrf.mxu0 }
 0x1d0   : > { %v980_v5 = vpack.c.bf16 %v942_v3, %v940_v6  ;;  %v2210_v3 = vld [vmem:[%s2961_s23 + $0x20] sm:$0xff]  }
 0x1d1   : > { %v2147_v23 = vunpack.c.h.bf16 %v2210_v3 }
 0x1d2   : > { %1047 = vmatmul.bf16.vlgmr.msra.gmra.mxu1 %v980_v5 }
 0x1d5   : > { %v962_v13 = vpop.f32.mrf.mxu2 }
 0x1d6   : > { %v984_v15 = vpack.c.bf16 %v962_v13, %v960_v30  ;;  %v2146_v13 = vunpack.c.l.bf16 %v2210_v3 }
 0x1d7   : > { %v945_v17 = vpop.f32.mrf.mxu0 }
 0x1d8   : > { %1067 = vmatmul.bf16.vlgmr.msra.gmra.mxu3 %v984_v15  ;;  %v1282_v31 = vmul.f32 %v2146_v13, %v3072_v1 }
 0x1dd   : > { %v965_v25 = vpop.f32.mrf.mxu2 }
 0x1df   : > { %v947_v27 = vpop.f32.mrf.mxu0 }
 0x1e0   : > { %v981_v29 = vpack.c.bf16 %v947_v27, %v945_v17 }
 0x1e2   : > { %1052 = vmatmul.bf16.gmra.mxu1 %v981_v29 }
 0x1e5   : > { %v967_v36 = vpop.f32.mrf.mxu2 }
 0x1e6   : > { %v985_v37 = vpack.c.bf16 %v967_v36, %v965_v25  ;;  %v1152_v25 = vpop.permute.xlu0 %1151 }
 0x1e7   : > { %v950_v38 = vpop.f32.mrf.mxu0 }
 0x1e8   : > { %1072 = vmatmul.bf16.gmra.mxu3 %v985_v37 }
 0x1ed   : > { %v970_v40 = vpop.f32.mrf.mxu2 }
 0x1ef   : > { %v952_v41 = vpop.f32.mrf.mxu0 }
 0x1f0   : > { %v982_v42 = vpack.c.bf16 %v952_v41, %v950_v38 }
 0x1f2   : > { %1057 = vmatmul.bf16.gmra.mxu1 %v982_v42 }
 0x1f5   : > { %v972_v44 = vpop.f32.mrf.mxu2 }
 0x1f6   : > { %v986_v45 = vpack.c.bf16 %v972_v44, %v970_v40  ;;  %v1283_v40 = vmul.f32 %v2147_v23, %v3072_v1 }
 0x1f7   : > { %v955_v46 = vpop.f32.mrf.mxu0 }
 0x1f8   : > { %1077 = vmatmul.bf16.gmra.mxu3 %v986_v45 }
 0x1fd   : > { %v975_v47 = vpop.f32.mrf.mxu2 }
 0x1ff   : > { %v957_v48 = vpop.f32.mrf.mxu0 }
 0x200   : > { %v983_v49 = vpack.c.bf16 %v957_v48, %v955_v46 }
 0x202   : > { %1062 = vmatmul.bf16.gmra.mxu1 %v983_v49 }
 0x205   : > { %v977_v50 = vpop.f32.mrf.mxu2 }
 0x206   : > { %v987_v51 = vpack.c.bf16 %v977_v50, %v975_v47 }
 0x208   : > { %1082 = vmatmul.bf16.gmra.mxu3 %v987_v51 }
 0x24f   : > { %v1048_v56 = vpop.f32.mrf.mxu1 }
 0x250   : > { %v1049_v57 = vadd.f32 %v1048_v56, %v3062_v54 }
 0x252   : > { %v1184_v60 = vmul.f32 %v1107_v52, %v1049_v57  ;;  %v1157_v52 = vpop.permute.xlu1 %1156 }
 0x254   : > { %v1203_v32 = vadd.f32 %v3068_v61, %v1184_v60 }
 0x256   : > { %v1219_v22 = vmax.f32 %v1203_v32, 0.0 }
 0x257   : > { %v1050_v28 = vpop.f32.mrf.mxu1 }
 0x258   : > { %v1051_v24 = vadd.f32 %v1050_v28, %v3062_v54  ;;  %v1290_v10 = vadd.f32 %v1274_v12, %v1219_v22 }
 0x25a   : > { %v1185_v20 = vmul.f32 %v1112_v58, %v1051_v24 }
 0x25b   : > { %v1068_v33 = vpop.f32.mrf.mxu3 }
 0x25c   : > { %v1204_v26 = vadd.f32 %v3068_v61, %v1185_v20  ;;  %v1069_v4 = vadd.f32 %v1068_v33, %v3062_v54 }
 0x25e   : > { %v1220_v2 = vmax.f32 %v1204_v26, 0.0  ;;  %v1192_v6 = vmul.f32 %v1147_v0, %v1069_v4  ;;  %v1162_v26 = vpop.permute.xlu2 %1161 }
 0x25f   : > { %v1053_v8 = vpop.f32.mrf.mxu1 }
 0x260   : > { %v1291_v30 = vadd.f32 %v1275_v34, %v1220_v2  ;;  %v1054_v5 = vadd.f32 %v1053_v8, %v3062_v54  ;;  %v1211_v11 = vadd.f32 %v3068_v61, %v1192_v6 }
 0x262   : > { %v2163_v7 = vpack.c.bf16 %v1291_v30, %v1290_v10  ;;  %v1186_v17 = vmul.f32 %v1117_v55, %v1054_v5  ;;  %v1227_v29 = vmax.f32 %v1211_v11, 0.0 }
 0x263   : > { %v1070_v15 = vpop.f32.mrf.mxu3 }
 0x264   : > { %2164 = vst [vmem:[%s3088_s4] sm:$0xff] %v2163_v7   ;;  %v1071_v21 = vadd.f32 %v1070_v15, %v3062_v54  ;;  %v1205_v38 = vadd.f32 %v3068_v61, %v1186_v17  ;;  %v1298_v44 = vadd.f32 %v1282_v31, %v1227_v29 }
 0x266   : > { %v1193_v27 = vmul.f32 %v1152_v25, %v1071_v21  ;;  %v1221_v48 = vmax.f32 %v1205_v38, 0.0 }
 0x267   : > { %v1055_v36 = vpop.f32.mrf.mxu1 }
 0x268   : > { %v1212_v39 = vadd.f32 %v3068_v61, %v1193_v27  ;;  %v1056_v41 = vadd.f32 %v1055_v36, %v3062_v54  ;;  %v1167_v27 = vpop.permute.xlu0 %1166 }
 0x26a   : > { %v1228_v42 = vmax.f32 %v1212_v39, 0.0  ;;  %v1187_v43 = vmul.f32 %v1122_v18, %v1056_v41 }
 0x26b   : > { %v2207_v19 = vld [vmem:[%s2961_s23 + $0x8] sm:$0xff]   ;;  %v1073_v47 = vpop.f32.mrf.mxu3 }
 0x26c   : > { %v2134_v35 = vunpack.c.l.bf16 %v2207_v19  ;;  %v2135_v37 = vunpack.c.h.bf16 %v2207_v19  ;;  %v1299_v49 = vadd.f32 %v1283_v40, %v1228_v42  ;;  %v1206_v50 = vadd.f32 %v3068_v61, %v1187_v43 }
 0x26d   : > { %v1074_v51 = vadd.f32 %v1073_v47, %v3062_v54 }
 0x26e   : > { %v1276_v45 = vmul.f32 %v2134_v35, %v3072_v1  ;;  %v1277_v46 = vmul.f32 %v2135_v37, %v3072_v1  ;;  %v2183_v55 = vpack.c.bf16 %v1299_v49, %v1298_v44  ;;  %v1222_v56 = vmax.f32 %v1206_v50, 0.0 }
 0x26f   : > { %v1194_v57 = vmul.f32 %v1157_v52, %v1074_v51  ;;  %v1058_v58 = vpop.f32.mrf.mxu1 }
 0x270   : > { %v1292_v60 = vadd.f32 %v1276_v45, %v1221_v48  ;;  %2217 = vst [vmem:[%s3088_s4 + $0x20] sm:$0xff] %v2183_v55   ;;  %v1293_v62 = vadd.f32 %v1277_v46, %v1222_v56  ;;  %v1059_v28 = vadd.f32 %v1058_v58, %v3062_v54  ;;  %v1172_v48 = vpop.permute.xlu1 %1171 }
 0x271   : > { %v1213_v24 = vadd.f32 %v3068_v61, %v1194_v57 }
 0x272   : > { %v2168_v32 = vpack.c.bf16 %v1293_v62, %v1292_v60  ;;  %v1188_v20 = vmul.f32 %v3059_v53, %v1059_v28 }
 0x273   : > { %v1075_v18 = vpop.f32.mrf.mxu3  ;;  %v1229_v4 = vmax.f32 %v1213_v24, 0.0 }
 0x274   : > { %v1076_v33 = vadd.f32 %v1075_v18, %v3062_v54  ;;  %v1207_v10 = vadd.f32 %v3068_v61, %v1188_v20 }
 0x276   : > { %v1195_v34 = vmul.f32 %v1162_v26, %v1076_v33  ;;  %v1223_v19 = vmax.f32 %v1207_v10, 0.0 }
 0x277   : > { %v2211_v63 = vld [vmem:[%s2961_s23 + $0x28] sm:$0xff]   ;;  %v1060_v6 = vpop.f32.mrf.mxu1 }
 0x278   : > { %v2150_v16 = vunpack.c.l.bf16 %v2211_v63  ;;  %2214 = vst [vmem:[%s3088_s4 + $0x8] sm:$0xff] %v2168_v32   ;;  %v2151_v22 = vunpack.c.h.bf16 %v2211_v63  ;;  %v1214_v30 = vadd.f32 %v3068_v61, %v1195_v34  ;;  %v1061_v53 = vadd.f32 %v1060_v6, %v3062_v54  ;;  %v1177_v34 = vpop.permute.xlu2 %1176 }
 0x27a   : > { %v1284_v0 = vmul.f32 %v2150_v16, %v3072_v1  ;;  %v1285_v3 = vmul.f32 %v2151_v22, %v3072_v1  ;;  %v1230_v5 = vmax.f32 %v1214_v30, 0.0  ;;  %v1189_v7 = vmul.f32 %v3065_v59, %v1061_v53 }
 0x27b   : > { %v1078_v17 = vpop.f32.mrf.mxu3 }
 0x27c   : > { %v1300_v11 = vadd.f32 %v1284_v0, %v1229_v4  ;;  %v1301_v21 = vadd.f32 %v1285_v3, %v1230_v5  ;;  %v1208_v23 = vadd.f32 %v3068_v61, %v1189_v7  ;;  %v1079_v25 = vadd.f32 %v1078_v17, %v3062_v54  ;;  %v1182_v5 = vpop.permute.xlu0 %1181 }
 0x27e   : > { %v2188_v29 = vpack.c.bf16 %v1301_v21, %v1300_v11  ;;  %v1224_v31 = vmax.f32 %v1208_v23, 0.0  ;;  %v1196_v35 = vmul.f32 %v1167_v27, %v1079_v25 }
 0x27f   : > { %v2208_v12 = vld [vmem:[%s2961_s23 + $0x10] sm:$0xff]   ;;  %v1063_v59 = vpop.f32.mrf.mxu1 }
 0x280   : > { %v2138_v2 = vunpack.c.l.bf16 %v2208_v12  ;;  %v2139_v8 = vunpack.c.h.bf16 %v2208_v12  ;;  %2218 = vst [vmem:[%s3088_s4 + $0x28] sm:$0xff] %v2188_v29   ;;  %v1064_v39 = vadd.f32 %v1063_v59, %v3062_v54  ;;  %v1215_v41 = vadd.f32 %v3068_v61, %v1196_v35 }
 0x282   : > { %v1278_v13 = vmul.f32 %v2138_v2, %v3072_v1  ;;  %v1279_v15 = vmul.f32 %v2139_v8, %v3072_v1  ;;  %v1190_v44 = vmul.f32 %v3077_v14, %v1064_v39  ;;  %v1231_v50 = vmax.f32 %v1215_v41, 0.0 }
 0x283   : > { %v1080_v43 = vpop.f32.mrf.mxu3 }
 0x284   : > { %v1294_v36 = vadd.f32 %v1278_v13, %v1223_v19  ;;  %v1295_v37 = vadd.f32 %v1279_v15, %v1224_v31  ;;  %v1081_v46 = vadd.f32 %v1080_v43, %v3062_v54  ;;  %v1209_v57 = vadd.f32 %v3068_v61, %v1190_v44 }
 0x286   : > { %v2173_v40 = vpack.c.bf16 %v1295_v37, %v1294_v36  ;;  %v1197_v49 = vmul.f32 %v1172_v48, %v1081_v46  ;;  %v1225_v18 = vmax.f32 %v1209_v57, 0.0 }
 0x287   : > { %v2212_v38 = vld [vmem:[%s2961_s23 + $0x30] sm:$0xff]   ;;  %v1065_v55 = vpop.f32.mrf.mxu1 }
 0x288   : > { %v2154_v42 = vunpack.c.l.bf16 %v2212_v38  ;;  %2215 = vst [vmem:[%s3088_s4 + $0x10] sm:$0xff] %v2173_v40   ;;  %v2155_v47 = vunpack.c.h.bf16 %v2212_v38  ;;  %v1216_v58 = vadd.f32 %v3068_v61, %v1197_v49  ;;  %v1066_v14 = vadd.f32 %v1065_v55, %v3062_v54 }
 0x28a   : > { %v1286_v51 = vmul.f32 %v2154_v42, %v3072_v1  ;;  %v1287_v60 = vmul.f32 %v2155_v47, %v3072_v1  ;;  %v1232_v62 = vmax.f32 %v1216_v58, 0.0  ;;  %v1191_v63 = vmul.f32 %v3085_v9, %v1066_v14 }
 0x28b   : > { %v1083_v16 = vpop.f32.mrf.mxu3 }
 0x28c   : > { %v1302_v28 = vadd.f32 %v1286_v51, %v1231_v50  ;;  %v1303_v20 = vadd.f32 %v1287_v60, %v1232_v62  ;;  %v1210_v12 = vadd.f32 %v3068_v61, %v1191_v63  ;;  %v1084_v33 = vadd.f32 %v1083_v16, %v3062_v54 }
 0x28e   : > { %v2193_v22 = vpack.c.bf16 %v1303_v20, %v1302_v28  ;;  %v1226_v26 = vmax.f32 %v1210_v12, 0.0  ;;  %v1198_v0 = vmul.f32 %v1177_v34, %v1084_v33 }
 0x28f   : > { %v2209_v45 = vld [vmem:[%s2961_s23 + $0x18] sm:$0xff]  }
 0x290   : > { %v2142_v52 = vunpack.c.l.bf16 %v2209_v45  ;;  %v2143_v56 = vunpack.c.h.bf16 %v2209_v45  ;;  %2219 = vst [vmem:[%s3088_s4 + $0x30] sm:$0xff] %v2193_v22   ;;  %v1217_v10 = vadd.f32 %v3068_v61, %v1198_v0 }
 0x292   : > { %v1280_v32 = vmul.f32 %v2142_v52, %v3072_v1  ;;  %v1281_v24 = vmul.f32 %v2143_v56, %v3072_v1  ;;  %v1233_v11 = vmax.f32 %v1217_v10, 0.0 }
 0x293   : > { %v1085_v8 = vpop.f32.mrf.mxu3 }
 0x294   : > { %v1296_v4 = vadd.f32 %v1280_v32, %v1225_v18  ;;  %v1297_v9 = vadd.f32 %v1281_v24, %v1226_v26  ;;  %v1086_v3 = vadd.f32 %v1085_v8, %v3062_v54 }
 0x296   : > { %v2178_v6 = vpack.c.bf16 %v1297_v9, %v1296_v4  ;;  %v1199_v7 = vmul.f32 %v1182_v5, %v1086_v3 }
 0x297   : > { %v2213_v2 = vld [vmem:[%s2961_s23 + $0x38] sm:$0xff]  }
 0x298   : > { %2216 = vst [vmem:[%s3088_s4 + $0x18] sm:$0xff] %v2178_v6   ;;  %v2158_v30 = vunpack.c.l.bf16 %v2213_v2  ;;  %v2159_v53 = vunpack.c.h.bf16 %v2213_v2  ;;  %v1218_v15 = vadd.f32 %v3068_v61, %v1199_v7 }
 0x29a   : > { %v1288_v13 = vmul.f32 %v2158_v30, %v3072_v1  ;;  %v1289_v17 = vmul.f32 %v2159_v53, %v3072_v1  ;;  %v1234_v19 = vmax.f32 %v1218_v15, 0.0 }
 0x29c   : > { %v1304_v21 = vadd.f32 %v1288_v13, %v1233_v11  ;;  %v1305_v23 = vadd.f32 %v1289_v17, %v1234_v19 }
 0x29e   : > { %v2198_v25 = vpack.c.bf16 %v1305_v23, %v1304_v21 }
 0x2a0   : > { %2220 = vst [vmem:[%s3088_s4 + $0x38] sm:$0xff] %v2198_v25  }
 0x2a1 PF: > { %v2087_v54 = vld [vmem:[%s2910_s19 + $0x38] sm:$0xff]  ;;  %v2086_v27 = vld [vmem:[%s2910_s19 + $0x30] sm:$0xff]  ;;  %v2085_v61 = vld [vmem:[%s2910_s19 + $0x28] sm:$0xff]  ;;  %s1342_s23 = sshra.s32 %s2904_s14, 3  ;;  %s2622_s14 = smov [#allocation12]  }
 0x2a2   : > { %1474 = vmatpush.bf16.msra.mxu0 %v2087_v54  ;;  %2261 = vmatpush.bf16.msra.mxu1 %v2087_v54  ;;  %v2084_v1 = vld [vmem:[%s2910_s19 + $0x20] sm:$0xff]  ;;  %v2083_v29 = vld [vmem:[%s2910_s19 + $0x18] sm:$0xff]  ;;  %v2082_v31 = vld [vmem:[%s2910_s19 + $0x10] sm:$0xff]  ;;  %s1960_s12 = sshll.u32 %s1342_s23, 2  ;;  %s3215_s26 = sld [smem:[#allocation27_spill]] }
 0x2a3   : > { %2262 = vmatpush.bf16.msra.mxu2 %v2087_v54  ;;  %2263 = vmatpush.bf16.msra.mxu3 %v2087_v54  ;;  %v2081_v35 = vld [vmem:[%s2910_s19 + $0x8] sm:$0xff]  ;;  %v2080_v59 = vld [vmem:[%s2910_s19] sm:$0xff]  ;;  %s1345_s17 = scalar_lea.vmem [#allocation2], %s1960_s12  ;;  %v1526_v16 = vld [vmem:[#allocation12 + $0x10] sm:$0xff]  ;;  %s1577_s19 = sshll.u32 %s2622_s14, 4  ;;  %s1578_s19 = int_to_ptr.vmem [resolvable:$true] %s1577_s19 }
 0x2a4   : > { %v1524_v44 = vld [vmem:[#allocation12] sm:$0xff]  ;;  %v1525_v52 = vld [vmem:[#allocation12 + $0x8] sm:$0xff]  ;;  %v1530_v18 = vld [vmem:[#allocation12 + $0x30] sm:$0xff]  ;;  %p2316_p4 = scmp.eq.s32.totalorder %s2699_s11, 4  ;;  %s2623_s24 = smov 128  }
 0x2a5   : > { %v1528_v45 = vld [vmem:[#allocation12 + $0x20] sm:$0xff]  ;;  %v1529_v55 = vld [vmem:[#allocation12 + $0x28] sm:$0xff]  ;;  %v1534_v0 = vld [vmem:[#allocation12 + $0x50] sm:$0xff]  ;;  %s2624_s21 = smov 8  }
 0x2a6   : > { %1475 = vmatpush.bf16.msra.mxu0 %v2086_v27  ;;  %2264 = vmatpush.bf16.msra.mxu1 %v2086_v27  ;;  %v1532_v50 = vld [vmem:[#allocation12 + $0x40] sm:$0xff]  ;;  %v1533_v32 = vld [vmem:[#allocation12 + $0x48] sm:$0xff]  ;;  %v1538_v2 = vld [vmem:[#allocation12 + $0x70] sm:$0xff] }
 0x2a7   : > { %2265 = vmatpush.bf16.msra.mxu2 %v2086_v27  ;;  %2266 = vmatpush.bf16.msra.mxu3 %v2086_v27  ;;  %v2072_v36 = vld [vmem:[%s1345_s17] sm:$0xff]  ;;  %v2074_v37 = vld [vmem:[%s1345_s17 + $0x10] sm:$0xff]  ;;  %v2073_v40 = vld [vmem:[%s1345_s17 + $0x8] sm:$0xff] }
 0x2a8   : > { %v2076_v38 = vld [vmem:[%s1345_s17 + $0x20] sm:$0xff]  ;;  %v2078_v39 = vld [vmem:[%s1345_s17 + $0x30] sm:$0xff]  ;;  %v2075_v41 = vld [vmem:[%s1345_s17 + $0x18] sm:$0xff]  ;;  %s1579_s20 = sshll.u32 %s3215_s26, 4  ;;  %s1580_s20 = int_to_ptr.hbm [resolvable:$true] %s1579_s20 }
 0x2a9   : > { %v2077_v42 = vld [vmem:[%s1345_s17 + $0x28] sm:$0xff]  ;;  %v2079_v43 = vld [vmem:[%s1345_s17 + $0x38] sm:$0xff] }
 0x2aa   : > { %1476 = vmatpush.bf16.msra.mxu0 %v2085_v61  ;;  %2267 = vmatpush.bf16.msra.mxu1 %v2085_v61  ;;  %v1536_v51 = vld [vmem:[#allocation12 + $0x60] sm:$0xff]  ;;  %v1537_v24 = vld [vmem:[#allocation12 + $0x68] sm:$0xff]  ;;  %v1527_v6 = vld [vmem:[#allocation12 + $0x18] sm:$0xff] }
 0x2ab   : > { %2268 = vmatpush.bf16.msra.mxu2 %v2085_v61  ;;  %2269 = vmatpush.bf16.msra.mxu3 %v2085_v61  ;;  %v1531_v8 = vld [vmem:[#allocation12 + $0x38] sm:$0xff] }
 0x2ac   : > { %v1535_v15 = vld [vmem:[#allocation12 + $0x58] sm:$0xff] }
 0x2ad   : > { %v1539_v17 = vld [vmem:[#allocation12 + $0x78] sm:$0xff] }
 0x2ae   : > { %1477 = vmatpush.bf16.msra.mxu0 %v2084_v1  ;;  %2270 = vmatpush.bf16.msra.mxu1 %v2084_v1 }
 0x2af   : > { %2271 = vmatpush.bf16.msra.mxu2 %v2084_v1  ;;  %2272 = vmatpush.bf16.msra.mxu3 %v2084_v1 }
 0x2b2   : > { %1478 = vmatpush.bf16.msra.mxu0 %v2083_v29  ;;  %2273 = vmatpush.bf16.msra.mxu1 %v2083_v29 }
 0x2b3   : > { %2274 = vmatpush.bf16.msra.mxu2 %v2083_v29  ;;  %2275 = vmatpush.bf16.msra.mxu3 %v2083_v29 }
 0x2b6   : > { %1479 = vmatpush.bf16.msra.mxu0 %v2082_v31  ;;  %2276 = vmatpush.bf16.msra.mxu1 %v2082_v31 }
 0x2b7   : > { %2277 = vmatpush.bf16.msra.mxu2 %v2082_v31  ;;  %2278 = vmatpush.bf16.msra.mxu3 %v2082_v31 }
 0x2ba   : > { %1480 = vmatpush.bf16.msra.mxu0 %v2081_v35  ;;  %2279 = vmatpush.bf16.msra.mxu1 %v2081_v35 }
 0x2bb   : > { %2280 = vmatpush.bf16.msra.mxu2 %v2081_v35  ;;  %2281 = vmatpush.bf16.msra.mxu3 %v2081_v35 }
 0x2be   : > { %1481 = vmatpush.bf16.msra.mxu0 %v2080_v59  ;;  %2282 = vmatpush.bf16.msra.mxu1 %v2080_v59 }
 0x2bf   : > { %2283 = vmatpush.bf16.msra.mxu2 %v2080_v59  ;;  %2284 = vmatpush.bf16.msra.mxu3 %v2080_v59 }
 0x2c1   : > { %1482 = vmatmul.bf16.vlgmr.msra.gmra.mxu0 %v2072_v36  ;;  %1492 = vmatmul.bf16.vlgmr.msra.gmra.mxu1 %v2074_v37 }
 0x2c2   : > { %1502 = vmatmul.bf16.vlgmr.msra.gmra.mxu2 %v2076_v38  ;;  %1512 = vmatmul.bf16.vlgmr.msra.gmra.mxu3 %v2078_v39 }
 0x2d1   : > { %1487 = vmatmul.bf16.gmra.mxu0 %v2073_v40  ;;  %1497 = vmatmul.bf16.gmra.mxu1 %v2075_v41 }
 0x2d2   : > { %1507 = vmatmul.bf16.gmra.mxu2 %v2077_v42  ;;  %1517 = vmatmul.bf16.gmra.mxu3 %v2079_v43 }
 0x33e   : > { %v1483_v46 = vpop.f32.mrf.mxu0  ;;  %v1493_v47 = vpop.f32.mrf.mxu1 }
 0x33f   : > { %v1540_v48 = vadd.f32 %v1524_v44, %v1483_v46  ;;  %v1544_v49 = vadd.f32 %v1528_v45, %v1493_v47 }
 0x341   : > { %1556 = vst [vmem:[#allocation12] sm:$0xff] %v1540_v48 }
 0x342   : > { %1560 = vst [vmem:[#allocation12 + $0x20] sm:$0xff] %v1544_v49 }
 0x345   : > { %v1503_v56 = vpop.f32.mrf.mxu2  ;;  %v1513_v57 = vpop.f32.mrf.mxu3 }
 0x346   : > { %v1548_v58 = vadd.f32 %v1532_v50, %v1503_v56  ;;  %v1552_v60 = vadd.f32 %v1536_v51, %v1513_v57  ;;  %v1485_v14 = vpop.f32.mrf.mxu0  ;;  %v1495_v62 = vpop.f32.mrf.mxu1 }
 0x347   : > { %v1541_v63 = vadd.f32 %v1525_v52, %v1485_v14  ;;  %v1545_v28 = vadd.f32 %v1529_v55, %v1495_v62 }
 0x348   : > { %1564 = vst [vmem:[#allocation12 + $0x40] sm:$0xff] %v1548_v58 }
 0x349   : > { %1568 = vst [vmem:[#allocation12 + $0x60] sm:$0xff] %v1552_v60 }
 0x34a   : > { %1557 = vst [vmem:[#allocation12 + $0x8] sm:$0xff] %v1541_v63 }
 0x34b   : > { %1561 = vst [vmem:[#allocation12 + $0x28] sm:$0xff] %v1545_v28 }
 0x34d   : > { %v1505_v20 = vpop.f32.mrf.mxu2  ;;  %v1515_v12 = vpop.f32.mrf.mxu3 }
 0x34e   : > { %v1549_v33 = vadd.f32 %v1533_v32, %v1505_v20  ;;  %v1553_v22 = vadd.f32 %v1537_v24, %v1515_v12  ;;  %v1488_v26 = vpop.f32.mrf.mxu0  ;;  %v1498_v34 = vpop.f32.mrf.mxu1 }
 0x34f   : > { %v1542_v4 = vadd.f32 %v1526_v16, %v1488_v26  ;;  %v1546_v9 = vadd.f32 %v1530_v18, %v1498_v34 }
 0x350   : > { %1565 = vst [vmem:[#allocation12 + $0x48] sm:$0xff] %v1549_v33 }
 0x351   : > { %1569 = vst [vmem:[#allocation12 + $0x68] sm:$0xff] %v1553_v22 }
 0x352   : > { %1558 = vst [vmem:[#allocation12 + $0x10] sm:$0xff] %v1542_v4 }
 0x353   : > { %1562 = vst [vmem:[#allocation12 + $0x30] sm:$0xff] %v1546_v9 }
 0x355   : > { %v1508_v10 = vpop.f32.mrf.mxu2  ;;  %v1518_v30 = vpop.f32.mrf.mxu3 }
 0x356   : > { %v1550_v3 = vadd.f32 %v1534_v0, %v1508_v10  ;;  %v1554_v53 = vadd.f32 %v1538_v2, %v1518_v30  ;;  %v1490_v5 = vpop.f32.mrf.mxu0  ;;  %v1500_v7 = vpop.f32.mrf.mxu1 }
 0x357   : > { %v1543_v11 = vadd.f32 %v1527_v6, %v1490_v5  ;;  %v1547_v13 = vadd.f32 %v1531_v8, %v1500_v7 }
 0x358   : > { %1566 = vst [vmem:[#allocation12 + $0x50] sm:$0xff] %v1550_v3 }
 0x359   : > { %1570 = vst [vmem:[#allocation12 + $0x70] sm:$0xff] %v1554_v53 }
 0x35a   : > { %1559 = vst [vmem:[#allocation12 + $0x18] sm:$0xff] %v1543_v11 }
 0x35b   : > { %1563 = vst [vmem:[#allocation12 + $0x38] sm:$0xff] %v1547_v13 }
 0x35d   : > { %v1510_v19 = vpop.f32.mrf.mxu2  ;;  %v1520_v21 = vpop.f32.mrf.mxu3 }
 0x35e   : > { %v1551_v23 = vadd.f32 %v1535_v15, %v1510_v19  ;;  %v1555_v25 = vadd.f32 %v1539_v17, %v1520_v21 }
 0x360   : > { %1567 = vst [vmem:[#allocation12 + $0x58] sm:$0xff] %v1551_v23 }
 0x361   : > { %1571 = vst [vmem:[#allocation12 + $0x78] sm:$0xff] %v1555_v25 }
 0x362   : > { %2296 = dma.vmem_to_hbm [thread:$0]  (%p2316_p4), %s1578_s19, 2048, %s1580_s20, [#allocation5], %s2623_s24, %s2623_s24, %s2624_s21  }
 0x363   : > { %2591 = dma.done.wait (%p2316_p4), [#allocation5], 2048  }
 0x364   : > { %2593 = vsyncadd (%p2316_p4), [#allocation5], 4294965248 }
 0x365 PF: > { %s3216_s30 = sld [smem:[#allocation18_spill]]  ;;  %s3220_s27 = smov %s2600_s28 }
 0x366   : > { %s3217_s22 = sld [smem:[#allocation17_spill]] }
 0x367   : > { %s3218_s29 = sld [smem:[#allocation20_spill]] }
 0x368   : > { %s3219_s11 = sld [smem:[#allocation19_spill]] }
 0x36b   : > { %s28_s10 = sadd.s32 1, %s3216_s30   ;;  %s3222_s30 = smov %s2612_s9 }
 0x36c   : > { %p25_p5 = scmp.ge.s32.totalorder %s28_s10, 7   ;;  %s3221_s28 = smov %s3217_s22 }
 0x36e   : > { %s3223_s9 = smov %s3219_s11  ;;  %27 = sbr.rel (!%p25_p5) target bundleno = 17 (0x11), region = 164 }
 0x373   :  { %1596 = vsyncpa [#allocation4], 1 }
 0x374   :  { %1598 = vsyncpa [#allocation4 + $0x1], 1 }
 0x375   :  { %1599 = vsyncpa [#allocation7], 1 }
 0x376   :  { %1601 = vsyncpa [#allocation7 + $0x1], 1 }
 0x377   :  { %1602 = vsyncpa [#allocation10], 1 }
 0x378   :  { %1604 = vsyncpa [#allocation10 + $0x1], 1 }
 0x379   :  { %1605 = vsyncpa [#allocation5], 1 }
 0x37a   :  { %1607 = vsyncpa [#allocation5 + $0x1], 1 }

</bundles_post_ra>
